<compile_context>
chip_gen: v5e
topology: v5e:2x2
jax: 0.10.0
libtpu: 0.0.40
codegen_flags: <defaults>
</compile_context>

<pallas_src>
import math

import jax
import jax.numpy as jnp
from jax.experimental import pallas as pl
from jax.experimental.pallas import tpu as pltpu

# ----------------------------- config ---------------------------------------
B = 2            # batch
S = 8            # sequence length
H = 128          # hidden size          (bert-base: 768)
NH = 4           # attention heads      (bert-base: 12)
DH = H // NH     # head dim
I = 512          # intermediate size    (bert-base: 3072)
L = 2            # encoder layers       (bert-base: 12)
M = B * S        # flattened token rows
VOCAB = 1000
TYPE_VOCAB = 2
MAX_POS = 64
LN_EPS = 1e-12
MASK_BIAS = -1e9  # additive attention mask, kept in f32


# --------------------------- in-kernel helpers -------------------------------
def _layernorm(x, gamma, beta):
    mu = jnp.mean(x, axis=-1, keepdims=True)
    var = jnp.mean((x - mu) * (x - mu), axis=-1, keepdims=True)
    return (x - mu) * jax.lax.rsqrt(var + LN_EPS) * gamma + beta


def _gelu(x):
    # tanh approximation of GELU (EUP-friendly); HF BERT default is erf-GELU.
    c = math.sqrt(2.0 / math.pi)
    return 0.5 * x * (1.0 + jnp.tanh(c * (x + 0.044715 * x * x * x)))


# ------------------------------ fused kernel ---------------------------------
def fused_bert_kernel(emb_ref, bias_ref, eg_ref, eb_ref,
                      wqkv_ref, bqkv_ref, wo_ref, bo_ref, g1_ref, b1_ref,
                      wi_ref, bi_ref, wo2_ref, bo2_ref, g2_ref, b2_ref,
                      pw_ref, pb_ref, ow_ref, ob_ref,
                      out_ref, x_sc, ctx_sc):
    l = pl.program_id(0)

    @pl.when(l == 0)
    def _():
        # embedding LayerNorm -> residual stream, resident in VMEM for all layers
        x_sc[...] = _layernorm(emb_ref[...], eg_ref[...], eb_ref[...])

    x = x_sc[...]                                     # (M, H) f32 residual stream
    x_bf = x.astype(jnp.bfloat16)

    # Fused QKV projection on the MXU (1/sqrt(DH) already folded into Wq/bq).
    qkv = jnp.dot(x_bf, wqkv_ref[0],
                  preferred_element_type=jnp.float32) + bqkv_ref[0]   # (M, 3H) f32
    qkv_bf = qkv.astype(jnp.bfloat16)                 # single cast; slices reused below

    bias = bias_ref[...]                              # (M, M) block-diag + padding, f32
    for h in range(NH):                               # static unroll over heads
        lo = h * DH
        qh = qkv_bf[:, lo:lo + DH]                    # (M, DH) bf16
        kh = qkv_bf[:, H + lo:H + lo + DH]
        vh = qkv_bf[:, 2 * H + lo:2 * H + lo + DH]
        s = jax.lax.dot_general(qh, kh, (((1,), (1,)), ((), ())),
                                preferred_element_type=jnp.float32) + bias
        s = s - jnp.max(s, axis=-1, keepdims=True)
        p = jnp.exp(s)
        p = p * pl.reciprocal(jnp.sum(p, axis=-1, keepdims=True), approx=True)
        # write the head's context directly into the (M, H) VMEM scratch
        ctx_sc[:, lo:lo + DH] = jnp.dot(p.astype(jnp.bfloat16), vh,
                                        preferred_element_type=jnp.float32)

    attn = jnp.dot(ctx_sc[...].astype(jnp.bfloat16), wo_ref[0],
                   preferred_element_type=jnp.float32) + bo_ref[0]
    h1 = _layernorm(x + attn, g1_ref[0], b1_ref[0])

    ff = _gelu(jnp.dot(h1.astype(jnp.bfloat16), wi_ref[0],
                       preferred_element_type=jnp.float32) + bi_ref[0])
    ff = jnp.dot(ff.astype(jnp.bfloat16), wo2_ref[0],
                 preferred_element_type=jnp.float32) + bo2_ref[0]
    x_new = _layernorm(h1 + ff, g2_ref[0], b2_ref[0])
    x_sc[...] = x_new

    @pl.when(l == L - 1)
    def _():
        # token-major flattening puts the B [CLS] rows first
        cls = x_new[0:B, :]                           # (B, H)
        pooled = jnp.tanh(jnp.dot(cls.astype(jnp.bfloat16), pw_ref[...],
                                  preferred_element_type=jnp.float32) + pb_ref[...])
        out_ref[...] = jnp.dot(pooled, ow_ref[...],
                               preferred_element_type=jnp.float32) + ob_ref[...]


# ------------------------------ wrapper --------------------------------------
def _const_spec(shape):
    n = len(shape)
    return pl.BlockSpec(shape, lambda l, n=n: (0,) * n)


def _layer_spec(shape):   # shape has a leading L axis iterated by the grid
    n = len(shape) - 1
    return pl.BlockSpec((1,) + shape[1:], lambda l, n=n: (l,) + (0,) * n)


def bert_encoder(emb_flat, attn_bias, p):
    flops = L * (2 * M * H * 3 * H            # fused QKV projection
                 + NH * 4 * M * M * DH        # QK^T + PV per head
                 + 2 * M * H * H              # attention output projection
                 + 4 * M * H * I)             # FFN in + out
    flops += 2 * B * H * H + 2 * B * H        # pooler + classifier head
    transcendentals = L * (NH * M * M + M * I) + B * H
    bytes_accessed = (
        2 * (L * (3 * H * H + H * H + 2 * H * I) + H * H)   # bf16 weights
        + 4 * (L * (3 * H + 6 * H + I) + 5 * H + 2)          # f32 biases / LN params
        + 4 * (M * H + M * M + B))                           # emb in, mask, logits out

    in_specs = [
        _const_spec((M, H)),            # embeddings (flattened, f32)
        _const_spec((M, M)),            # additive attention bias (f32)
        _const_spec((1, H)),            # emb LN gamma
        _const_spec((1, H)),            # emb LN beta
        _layer_spec((L, H, 3 * H)),     # Wqkv (bf16, q-scale folded)
        _layer_spec((L, 1, 3 * H)),     # bqkv
        _layer_spec((L, H, H)),         # Wo (bf16)
        _layer_spec((L, 1, H)),         # bo
        _layer_spec((L, 1, H)),         # LN1 gamma
        _layer_spec((L, 1, H)),         # LN1 beta
        _layer_spec((L, H, I)),         # FFN in (bf16)
        _layer_spec((L, 1, I)),         # FFN in bias
        _layer_spec((L, I, H)),         # FFN out (bf16)
        _layer_spec((L, 1, H)),         # FFN out bias
        _layer_spec((L, 1, H)),         # LN2 gamma
        _layer_spec((L, 1, H)),         # LN2 beta
        _const_spec((H, H)),            # pooler W (bf16)
        _const_spec((1, H)),            # pooler b
        _const_spec((H, 1)),            # head W
        _const_spec((1, 1)),            # head b
    ]

    return pl.pallas_call(
        fused_bert_kernel,
        out_shape=jax.ShapeDtypeStruct((B, 1), jnp.float32),
        grid=(L,),
        in_specs=in_specs,
        out_specs=pl.BlockSpec((B, 1), lambda l: (0, 0)),
        scratch_shapes=[pltpu.VMEM((M, H), jnp.float32),    # residual stream
                        pltpu.VMEM((M, H), jnp.float32)],   # attention context
        compiler_params=pltpu.CompilerParams(
            dimension_semantics=("arbitrary",),
            vmem_limit_bytes=32 * 1024 * 1024),
        cost_estimate=pl.CostEstimate(flops=flops,
                                      transcendentals=transcendentals,
                                      bytes_accessed=bytes_accessed),
    )(emb_flat, attn_bias,
      p["emb_ln_g"], p["emb_ln_b"],
      p["wqkv"], p["bqkv"], p["wo"], p["bo"], p["ln1_g"], p["ln1_b"],
      p["wi"], p["bi"], p["wo2"], p["bo2"], p["ln2_g"], p["ln2_b"],
      p["pool_w"], p["pool_b"], p["out_w"], p["out_b"])


# ------------------------------ parameters ------------------------------------
def init_params(key):
    keys = iter(jax.random.split(key, 64))
    dense = lambda shape: 0.02 * jax.random.normal(next(keys), shape, jnp.float32)
    ones = lambda shape: jnp.ones(shape, jnp.float32)
    zeros = lambda shape: jnp.zeros(shape, jnp.float32)

    scale = 1.0 / math.sqrt(DH)
    wqkv, bqkv, wo, bo, g1, b1 = [], [], [], [], [], []
    wi, bi, wo2, bo2, g2, b2 = [], [], [], [], [], []
    for _ in range(L):
        wq, wk, wv = dense((H, H)), dense((H, H)), dense((H, H))
        bq, bk, bv = zeros((1, H)), zeros((1, H)), zeros((1, H))
        # fold the 1/sqrt(head_dim) attention scale into the Q projection
        wqkv.append(jnp.concatenate([wq * scale, wk, wv], axis=1))
        bqkv.append(jnp.concatenate([bq * scale, bk, bv], axis=1))
        wo.append(dense((H, H))); bo.append(zeros((1, H)))
        g1.append(ones((1, H)));  b1.append(zeros((1, H)))
        wi.append(dense((H, I))); bi.append(zeros((1, I)))
        wo2.append(dense((I, H))); bo2.append(zeros((1, H)))
        g2.append(ones((1, H)));  b2.append(zeros((1, H)))

    stack = jnp.stack
    return {
        "word_emb": dense((VOCAB, H)),
        "pos_emb": dense((MAX_POS, H)),
        "type_emb": dense((TYPE_VOCAB, H)),
        "emb_ln_g": ones((1, H)),
        "emb_ln_b": zeros((1, H)),
        # bf16 stacked weights (halved DMA / full-rate MXU); biases & LN stay f32
        "wqkv": stack(wqkv).astype(jnp.bfloat16),   # (L, H, 3H)
        "bqkv": stack(bqkv),                        # (L, 1, 3H)
        "wo": stack(wo).astype(jnp.bfloat16),       # (L, H, H)
        "bo": stack(bo),
        "ln1_g": stack(g1), "ln1_b": stack(b1),
        "wi": stack(wi).astype(jnp.bfloat16),       # (L, H, I)
        "bi": stack(bi),
        "wo2": stack(wo2).astype(jnp.bfloat16),     # (L, I, H)
        "bo2": stack(bo2),
        "ln2_g": stack(g2), "ln2_b": stack(b2),
        "pool_w": dense((H, H)).astype(jnp.bfloat16),
        "pool_b": zeros((1, H)),
        "out_w": dense((H, 1)),
        "out_b": zeros((1, 1)),
    }


# ------------------------------ forward ---------------------------------------
@jax.jit
def bert_forward(ids, mask, token_type_ids, params):
    # embedding gathers stay in XLA; everything else runs in one Pallas call
    pos = jnp.arange(S)
    emb = (jnp.take(params["word_emb"], ids, axis=0)
           + jnp.take(params["pos_emb"], pos, axis=0)[None, :, :]
           + jnp.take(params["type_emb"], token_type_ids, axis=0))       # (B, S, H)

    # token-major flattening: row i = s*B + b, so the B [CLS] rows come first
    emb_flat = jnp.transpose(emb, (1, 0, 2)).reshape(M, H)

    # combined additive attention bias (M, M): block-diagonal over batches
    # (tokens only attend within their own sequence) plus key-padding mask.
    # Kept in f32; -1e9 is not representable in bf16.
    row_b = jnp.arange(M) % B
    same_batch = row_b[:, None] == row_b[None, :]
    key_valid = jnp.transpose(mask).reshape(M) > 0
    attn_bias = jnp.where(same_batch & key_valid[None, :],
                          0.0, MASK_BIAS).astype(jnp.float32)

    return bert_encoder(emb_flat, attn_bias, params)                     # (B, 1)


# ------------------------------ main -------------------------------------------
if __name__ == "__main__":
    key = jax.random.PRNGKey(0)
    k_param, k_ids, k_tt = jax.random.split(key, 3)

    params = init_params(k_param)

    ids = jax.random.randint(k_ids, (B, S), 0, VOCAB, dtype=jnp.int32)
    token_type_ids = jax.random.randint(k_tt, (B, S), 0, TYPE_VOCAB, dtype=jnp.int32)
    # pad the tail of the second sequence
    mask = jnp.stack([jnp.ones((S,), jnp.int32),
                      (jnp.arange(S) < S - 2).astype(jnp.int32)], axis=0)

    out = bert_forward(ids, mask, token_type_ids, params)
    jax.block_until_ready(out)
    assert out.shape == (B, 1) and out.dtype == jnp.float32
    print("KERNEL_OK")
</pallas_src>

<mosaic_0001>
module attributes {stable_mosaic.version = 11 : i64} {
  func.func @fused_bert_kernel(%arg0: i32, %arg1: memref<16x128xf32, #tpu.memory_space<vmem>>, %arg2: memref<16x16xf32, #tpu.memory_space<vmem>>, %arg3: memref<1x128xf32, #tpu.memory_space<vmem>>, %arg4: memref<1x128xf32, #tpu.memory_space<vmem>>, %arg5: memref<1x128x384xbf16, #tpu.memory_space<vmem>>, %arg6: memref<1x1x384xf32, #tpu.memory_space<vmem>>, %arg7: memref<1x128x128xbf16, #tpu.memory_space<vmem>>, %arg8: memref<1x1x128xf32, #tpu.memory_space<vmem>>, %arg9: memref<1x1x128xf32, #tpu.memory_space<vmem>>, %arg10: memref<1x1x128xf32, #tpu.memory_space<vmem>>, %arg11: memref<1x128x512xbf16, #tpu.memory_space<vmem>>, %arg12: memref<1x1x512xf32, #tpu.memory_space<vmem>>, %arg13: memref<1x512x128xbf16, #tpu.memory_space<vmem>>, %arg14: memref<1x1x128xf32, #tpu.memory_space<vmem>>, %arg15: memref<1x1x128xf32, #tpu.memory_space<vmem>>, %arg16: memref<1x1x128xf32, #tpu.memory_space<vmem>>, %arg17: memref<128x128xbf16, #tpu.memory_space<vmem>>, %arg18: memref<1x128xf32, #tpu.memory_space<vmem>>, %arg19: memref<128x1xf32, #tpu.memory_space<vmem>>, %arg20: memref<1x1xf32, #tpu.memory_space<vmem>>, %arg21: memref<2x1xf32, #tpu.memory_space<vmem>>, %arg22: memref<16x128xf32, #tpu.memory_space<vmem>>, %arg23: memref<16x128xf32, #tpu.memory_space<vmem>>) attributes {dimension_semantics = [#tpu.dimension_semantics<arbitrary>], iteration_bounds = array<i64: 2>, scalar_prefetch = 0 : i64, scratch_operands = 2 : i64, tpu.core_type = #tpu.core_type<tc>, window_params = [{pipeline_mode = #tpu.pipeline_mode<synchronous>, transform_indices = @transform_0, window_bounds = array<i64: 16, 128>}, {pipeline_mode = #tpu.pipeline_mode<synchronous>, transform_indices = @transform_1, window_bounds = array<i64: 16, 16>}, {pipeline_mode = #tpu.pipeline_mode<synchronous>, transform_indices = @transform_2, window_bounds = array<i64: 1, 128>}, {pipeline_mode = #tpu.pipeline_mode<synchronous>, transform_indices = @transform_3, window_bounds = array<i64: 1, 128>}, {transform_indices = @transform_4, window_bounds = array<i64: 1, 128, 384>}, {transform_indices = @transform_5, window_bounds = array<i64: 1, 1, 384>}, {transform_indices = @transform_6, window_bounds = array<i64: 1, 128, 128>}, {transform_indices = @transform_7, window_bounds = array<i64: 1, 1, 128>}, {transform_indices = @transform_8, window_bounds = array<i64: 1, 1, 128>}, {transform_indices = @transform_9, window_bounds = array<i64: 1, 1, 128>}, {transform_indices = @transform_10, window_bounds = array<i64: 1, 128, 512>}, {transform_indices = @transform_11, window_bounds = array<i64: 1, 1, 512>}, {transform_indices = @transform_12, window_bounds = array<i64: 1, 512, 128>}, {transform_indices = @transform_13, window_bounds = array<i64: 1, 1, 128>}, {transform_indices = @transform_14, window_bounds = array<i64: 1, 1, 128>}, {transform_indices = @transform_15, window_bounds = array<i64: 1, 1, 128>}, {pipeline_mode = #tpu.pipeline_mode<synchronous>, transform_indices = @transform_16, window_bounds = array<i64: 128, 128>}, {pipeline_mode = #tpu.pipeline_mode<synchronous>, transform_indices = @transform_17, window_bounds = array<i64: 1, 128>}, {pipeline_mode = #tpu.pipeline_mode<synchronous>, transform_indices = @transform_18, window_bounds = array<i64: 128, 1>}, {pipeline_mode = #tpu.pipeline_mode<synchronous>, transform_indices = @transform_19, window_bounds = array<i64: 1, 1>}, {pipeline_mode = #tpu.pipeline_mode<synchronous>, transform_indices = @transform_20, window_bounds = array<i64: 2, 1>}]} {
    %c0_i32 = arith.constant 0 : i32
    %0 = arith.cmpi eq, %arg0, %c0_i32 : i32
    %1 = arith.extui %0 : i1 to i32
    %c0_i32_0 = arith.constant 0 : i32
    %2 = arith.cmpi ne, %1, %c0_i32_0 : i32
    scf.if %2 {
      %c0_83 = arith.constant 0 : index
      %c0_84 = arith.constant 0 : index
      %186 = vector.load %arg1[%c0_83, %c0_84] : memref<16x128xf32, #tpu.memory_space<vmem>>, vector<16x128xf32>
      %c0_85 = arith.constant 0 : index
      %c0_86 = arith.constant 0 : index
      %187 = vector.load %arg3[%c0_85, %c0_86] : memref<1x128xf32, #tpu.memory_space<vmem>>, vector<1x128xf32>
      %c0_87 = arith.constant 0 : index
      %c0_88 = arith.constant 0 : index
      %188 = vector.load %arg4[%c0_87, %c0_88] : memref<1x128xf32, #tpu.memory_space<vmem>>, vector<1x128xf32>
      %cst_89 = arith.constant dense<0.000000e+00> : vector<16xf32>
      %189 = vector.multi_reduction <add>, %186, %cst_89 [1] : vector<16x128xf32> to vector<16xf32>
      %190 = vector.shape_cast %189 : vector<16xf32> to vector<16x1xf32>
      %cst_90 = arith.constant 1.280000e+02 : f32
      %191 = vector.broadcast %cst_90 : f32 to vector<16x1xf32>
      %192 = arith.divf %190, %191 : vector<16x1xf32>
      %193 = vector.broadcast %192 : vector<16x1xf32> to vector<16x128xf32>
      %194 = arith.subf %186, %193 : vector<16x128xf32>
      %195 = vector.broadcast %192 : vector<16x1xf32> to vector<16x128xf32>
      %196 = arith.subf %186, %195 : vector<16x128xf32>
      %197 = arith.mulf %194, %196 : vector<16x128xf32>
      %cst_91 = arith.constant dense<0.000000e+00> : vector<16xf32>
      %198 = vector.multi_reduction <add>, %197, %cst_91 [1] : vector<16x128xf32> to vector<16xf32>
      %199 = vector.shape_cast %198 : vector<16xf32> to vector<16x1xf32>
      %cst_92 = arith.constant 1.280000e+02 : f32
      %200 = vector.broadcast %cst_92 : f32 to vector<16x1xf32>
      %201 = arith.divf %199, %200 : vector<16x1xf32>
      %202 = vector.broadcast %192 : vector<16x1xf32> to vector<16x128xf32>
      %203 = arith.subf %186, %202 : vector<16x128xf32>
      %cst_93 = arith.constant 9.99999996E-13 : f32
      %204 = vector.broadcast %cst_93 : f32 to vector<16x1xf32>
      %205 = arith.addf %201, %204 : vector<16x1xf32>
      %206 = math.rsqrt %205 : vector<16x1xf32>
      %207 = vector.broadcast %206 : vector<16x1xf32> to vector<16x128xf32>
      %208 = arith.mulf %203, %207 : vector<16x128xf32>
      %209 = vector.broadcast %187 : vector<1x128xf32> to vector<16x128xf32>
      %210 = arith.mulf %208, %209 : vector<16x128xf32>
      %211 = vector.broadcast %188 : vector<1x128xf32> to vector<16x128xf32>
      %212 = arith.addf %210, %211 : vector<16x128xf32>
      %c0_94 = arith.constant 0 : index
      %c0_95 = arith.constant 0 : index
      %213 = vector.load %arg22[%c0_94, %c0_95] : memref<16x128xf32, #tpu.memory_space<vmem>>, vector<16x128xf32>
      tpu.vector_store %arg22[%c0_94, %c0_95], %212 {strides = array<i32>} : memref<16x128xf32, #tpu.memory_space<vmem>>, vector<16x128xf32>,
    } else {
    }
    %c0 = arith.constant 0 : index
    %c0_1 = arith.constant 0 : index
    %3 = vector.load %arg22[%c0, %c0_1] : memref<16x128xf32, #tpu.memory_space<vmem>>, vector<16x128xf32>
    %4 = arith.truncf %3 : vector<16x128xf32> to vector<16x128xbf16>
    %c0_2 = arith.constant 0 : index
    %c0_3 = arith.constant 0 : index
    %c0_4 = arith.constant 0 : index
    %5 = vector.load %arg5[%c0_2, %c0_3, %c0_4] : memref<1x128x384xbf16, #tpu.memory_space<vmem>>, vector<1x128x384xbf16>
    %6 = vector.shape_cast %5 : vector<1x128x384xbf16> to vector<128x384xbf16>
    %cst = arith.constant dense<0.000000e+00> : vector<16x384xf32>
    %7 = tpu.matmul %4, %6, %cst {dimension_numbers = #tpu.dot_dimension_numbers<[1], [0], [0], [1], [0, 0, 1, 1], [], []>} : vector<16x128xbf16>, vector<128x384xbf16>, vector<16x384xf32> -> vector<16x384xf32>
    %c0_5 = arith.constant 0 : index
    %c0_6 = arith.constant 0 : index
    %c0_7 = arith.constant 0 : index
    %8 = vector.load %arg6[%c0_5, %c0_6, %c0_7] : memref<1x1x384xf32, #tpu.memory_space<vmem>>, vector<1x1x384xf32>
    %9 = vector.shape_cast %8 : vector<1x1x384xf32> to vector<1x384xf32>
    %10 = vector.broadcast %9 : vector<1x384xf32> to vector<16x384xf32>
    %11 = arith.addf %7, %10 : vector<16x384xf32>
    %12 = arith.truncf %11 : vector<16x384xf32> to vector<16x384xbf16>
    %c0_8 = arith.constant 0 : index
    %c0_9 = arith.constant 0 : index
    %13 = vector.load %arg2[%c0_8, %c0_9] : memref<16x16xf32, #tpu.memory_space<vmem>>, vector<16x16xf32>
    %14 = vector.extract_strided_slice %12 {offsets = [0, 0], sizes = [16, 32], strides = [1, 1]} : vector<16x384xbf16> to vector<16x32xbf16>
    %15 = vector.extract_strided_slice %12 {offsets = [0, 128], sizes = [16, 32], strides = [1, 1]} : vector<16x384xbf16> to vector<16x32xbf16>
    %16 = vector.extract_strided_slice %12 {offsets = [0, 256], sizes = [16, 32], strides = [1, 1]} : vector<16x384xbf16> to vector<16x32xbf16>
    %cst_10 = arith.constant dense<0.000000e+00> : vector<16x16xf32>
    %17 = tpu.matmul %14, %15, %cst_10 {dimension_numbers = #tpu.dot_dimension_numbers<[1], [1], [0], [0], [0, 0, 1, 0], [], []>} : vector<16x32xbf16>, vector<16x32xbf16>, vector<16x16xf32> -> vector<16x16xf32>
    %18 = arith.addf %17, %13 : vector<16x16xf32>
    %cst_11 = arith.constant dense<0xFF800000> : vector<16xf32>
    %19 = vector.multi_reduction <maximumf>, %18, %cst_11 [1] : vector<16x16xf32> to vector<16xf32>
    %20 = vector.shape_cast %19 : vector<16xf32> to vector<16x1xf32>
    %21 = vector.broadcast %20 : vector<16x1xf32> to vector<16x16xf32>
    %22 = arith.subf %18, %21 : vector<16x16xf32>
    %23 = math.exp %22 : vector<16x16xf32>
    %cst_12 = arith.constant dense<0.000000e+00> : vector<16xf32>
    %24 = vector.multi_reduction <add>, %23, %cst_12 [1] : vector<16x16xf32> to vector<16xf32>
    %25 = vector.shape_cast %24 : vector<16xf32> to vector<16x1xf32>
    %26 = tpu.reciprocal %25 {approx = true} : vector<16x1xf32> -> vector<16x1xf32>
    %27 = vector.broadcast %26 : vector<16x1xf32> to vector<16x16xf32>
    %28 = arith.mulf %23, %27 : vector<16x16xf32>
    %29 = arith.truncf %28 : vector<16x16xf32> to vector<16x16xbf16>
    %cst_13 = arith.constant dense<0.000000e+00> : vector<16x32xf32>
    %30 = tpu.matmul %29, %16, %cst_13 {dimension_numbers = #tpu.dot_dimension_numbers<[1], [0], [0], [1], [0, 0, 1, 1], [], []>} : vector<16x16xbf16>, vector<16x32xbf16>, vector<16x32xf32> -> vector<16x32xf32>
    %c0_14 = arith.constant 0 : index
    %c0_15 = arith.constant 0 : index
    %31 = vector.load %arg23[%c0_14, %c0_15] : memref<16x128xf32, #tpu.memory_space<vmem>>, vector<16x32xf32>
    tpu.vector_store %arg23[%c0_14, %c0_15], %30 {strides = array<i32>} : memref<16x128xf32, #tpu.memory_space<vmem>>, vector<16x32xf32>,
    %32 = vector.extract_strided_slice %12 {offsets = [0, 32], sizes = [16, 32], strides = [1, 1]} : vector<16x384xbf16> to vector<16x32xbf16>
    %33 = vector.extract_strided_slice %12 {offsets = [0, 160], sizes = [16, 32], strides = [1, 1]} : vector<16x384xbf16> to vector<16x32xbf16>
    %34 = vector.extract_strided_slice %12 {offsets = [0, 288], sizes = [16, 32], strides = [1, 1]} : vector<16x384xbf16> to vector<16x32xbf16>
    %cst_16 = arith.constant dense<0.000000e+00> : vector<16x16xf32>
    %35 = tpu.matmul %32, %33, %cst_16 {dimension_numbers = #tpu.dot_dimension_numbers<[1], [1], [0], [0], [0, 0, 1, 0], [], []>} : vector<16x32xbf16>, vector<16x32xbf16>, vector<16x16xf32> -> vector<16x16xf32>
    %36 = arith.addf %35, %13 : vector<16x16xf32>
    %cst_17 = arith.constant dense<0xFF800000> : vector<16xf32>
    %37 = vector.multi_reduction <maximumf>, %36, %cst_17 [1] : vector<16x16xf32> to vector<16xf32>
    %38 = vector.shape_cast %37 : vector<16xf32> to vector<16x1xf32>
    %39 = vector.broadcast %38 : vector<16x1xf32> to vector<16x16xf32>
    %40 = arith.subf %36, %39 : vector<16x16xf32>
    %41 = math.exp %40 : vector<16x16xf32>
    %cst_18 = arith.constant dense<0.000000e+00> : vector<16xf32>
    %42 = vector.multi_reduction <add>, %41, %cst_18 [1] : vector<16x16xf32> to vector<16xf32>
    %43 = vector.shape_cast %42 : vector<16xf32> to vector<16x1xf32>
    %44 = tpu.reciprocal %43 {approx = true} : vector<16x1xf32> -> vector<16x1xf32>
    %45 = vector.broadcast %44 : vector<16x1xf32> to vector<16x16xf32>
    %46 = arith.mulf %41, %45 : vector<16x16xf32>
    %47 = arith.truncf %46 : vector<16x16xf32> to vector<16x16xbf16>
    %cst_19 = arith.constant dense<0.000000e+00> : vector<16x32xf32>
    %48 = tpu.matmul %47, %34, %cst_19 {dimension_numbers = #tpu.dot_dimension_numbers<[1], [0], [0], [1], [0, 0, 1, 1], [], []>} : vector<16x16xbf16>, vector<16x32xbf16>, vector<16x32xf32> -> vector<16x32xf32>
    %c0_20 = arith.constant 0 : index
    %c32 = arith.constant 32 : index
    %49 = vector.load %arg23[%c0_20, %c32] : memref<16x128xf32, #tpu.memory_space<vmem>>, vector<16x32xf32>
    tpu.vector_store %arg23[%c0_20, %c32], %48 {strides = array<i32>} : memref<16x128xf32, #tpu.memory_space<vmem>>, vector<16x32xf32>,
    %50 = vector.extract_strided_slice %12 {offsets = [0, 64], sizes = [16, 32], strides = [1, 1]} : vector<16x384xbf16> to vector<16x32xbf16>
    %51 = vector.extract_strided_slice %12 {offsets = [0, 192], sizes = [16, 32], strides = [1, 1]} : vector<16x384xbf16> to vector<16x32xbf16>
    %52 = vector.extract_strided_slice %12 {offsets = [0, 320], sizes = [16, 32], strides = [1, 1]} : vector<16x384xbf16> to vector<16x32xbf16>
    %cst_21 = arith.constant dense<0.000000e+00> : vector<16x16xf32>
    %53 = tpu.matmul %50, %51, %cst_21 {dimension_numbers = #tpu.dot_dimension_numbers<[1], [1], [0], [0], [0, 0, 1, 0], [], []>} : vector<16x32xbf16>, vector<16x32xbf16>, vector<16x16xf32> -> vector<16x16xf32>
    %54 = arith.addf %53, %13 : vector<16x16xf32>
    %cst_22 = arith.constant dense<0xFF800000> : vector<16xf32>
    %55 = vector.multi_reduction <maximumf>, %54, %cst_22 [1] : vector<16x16xf32> to vector<16xf32>
    %56 = vector.shape_cast %55 : vector<16xf32> to vector<16x1xf32>
    %57 = vector.broadcast %56 : vector<16x1xf32> to vector<16x16xf32>
    %58 = arith.subf %54, %57 : vector<16x16xf32>
    %59 = math.exp %58 : vector<16x16xf32>
    %cst_23 = arith.constant dense<0.000000e+00> : vector<16xf32>
    %60 = vector.multi_reduction <add>, %59, %cst_23 [1] : vector<16x16xf32> to vector<16xf32>
    %61 = vector.shape_cast %60 : vector<16xf32> to vector<16x1xf32>
    %62 = tpu.reciprocal %61 {approx = true} : vector<16x1xf32> -> vector<16x1xf32>
    %63 = vector.broadcast %62 : vector<16x1xf32> to vector<16x16xf32>
    %64 = arith.mulf %59, %63 : vector<16x16xf32>
    %65 = arith.truncf %64 : vector<16x16xf32> to vector<16x16xbf16>
    %cst_24 = arith.constant dense<0.000000e+00> : vector<16x32xf32>
    %66 = tpu.matmul %65, %52, %cst_24 {dimension_numbers = #tpu.dot_dimension_numbers<[1], [0], [0], [1], [0, 0, 1, 1], [], []>} : vector<16x16xbf16>, vector<16x32xbf16>, vector<16x32xf32> -> vector<16x32xf32>
    %c0_25 = arith.constant 0 : index
    %c64 = arith.constant 64 : index
    %67 = vector.load %arg23[%c0_25, %c64] : memref<16x128xf32, #tpu.memory_space<vmem>>, vector<16x32xf32>
    tpu.vector_store %arg23[%c0_25, %c64], %66 {strides = array<i32>} : memref<16x128xf32, #tpu.memory_space<vmem>>, vector<16x32xf32>,
    %68 = vector.extract_strided_slice %12 {offsets = [0, 96], sizes = [16, 32], strides = [1, 1]} : vector<16x384xbf16> to vector<16x32xbf16>
    %69 = vector.extract_strided_slice %12 {offsets = [0, 224], sizes = [16, 32], strides = [1, 1]} : vector<16x384xbf16> to vector<16x32xbf16>
    %70 = vector.extract_strided_slice %12 {offsets = [0, 352], sizes = [16, 32], strides = [1, 1]} : vector<16x384xbf16> to vector<16x32xbf16>
    %cst_26 = arith.constant dense<0.000000e+00> : vector<16x16xf32>
    %71 = tpu.matmul %68, %69, %cst_26 {dimension_numbers = #tpu.dot_dimension_numbers<[1], [1], [0], [0], [0, 0, 1, 0], [], []>} : vector<16x32xbf16>, vector<16x32xbf16>, vector<16x16xf32> -> vector<16x16xf32>
    %72 = arith.addf %71, %13 : vector<16x16xf32>
    %cst_27 = arith.constant dense<0xFF800000> : vector<16xf32>
    %73 = vector.multi_reduction <maximumf>, %72, %cst_27 [1] : vector<16x16xf32> to vector<16xf32>
    %74 = vector.shape_cast %73 : vector<16xf32> to vector<16x1xf32>
    %75 = vector.broadcast %74 : vector<16x1xf32> to vector<16x16xf32>
    %76 = arith.subf %72, %75 : vector<16x16xf32>
    %77 = math.exp %76 : vector<16x16xf32>
    %cst_28 = arith.constant dense<0.000000e+00> : vector<16xf32>
    %78 = vector.multi_reduction <add>, %77, %cst_28 [1] : vector<16x16xf32> to vector<16xf32>
    %79 = vector.shape_cast %78 : vector<16xf32> to vector<16x1xf32>
    %80 = tpu.reciprocal %79 {approx = true} : vector<16x1xf32> -> vector<16x1xf32>
    %81 = vector.broadcast %80 : vector<16x1xf32> to vector<16x16xf32>
    %82 = arith.mulf %77, %81 : vector<16x16xf32>
    %83 = arith.truncf %82 : vector<16x16xf32> to vector<16x16xbf16>
    %cst_29 = arith.constant dense<0.000000e+00> : vector<16x32xf32>
    %84 = tpu.matmul %83, %70, %cst_29 {dimension_numbers = #tpu.dot_dimension_numbers<[1], [0], [0], [1], [0, 0, 1, 1], [], []>} : vector<16x16xbf16>, vector<16x32xbf16>, vector<16x32xf32> -> vector<16x32xf32>
    %c0_30 = arith.constant 0 : index
    %c96 = arith.constant 96 : index
    %85 = vector.load %arg23[%c0_30, %c96] : memref<16x128xf32, #tpu.memory_space<vmem>>, vector<16x32xf32>
    tpu.vector_store %arg23[%c0_30, %c96], %84 {strides = array<i32>} : memref<16x128xf32, #tpu.memory_space<vmem>>, vector<16x32xf32>,
    %c0_31 = arith.constant 0 : index
    %c0_32 = arith.constant 0 : index
    %86 = vector.load %arg23[%c0_31, %c0_32] : memref<16x128xf32, #tpu.memory_space<vmem>>, vector<16x128xf32>
    %87 = arith.truncf %86 : vector<16x128xf32> to vector<16x128xbf16>
    %c0_33 = arith.constant 0 : index
    %c0_34 = arith.constant 0 : index
    %c0_35 = arith.constant 0 : index
    %88 = vector.load %arg7[%c0_33, %c0_34, %c0_35] : memref<1x128x128xbf16, #tpu.memory_space<vmem>>, vector<1x128x128xbf16>
    %89 = vector.shape_cast %88 : vector<1x128x128xbf16> to vector<128x128xbf16>
    %cst_36 = arith.constant dense<0.000000e+00> : vector<16x128xf32>
    %90 = tpu.matmul %87, %89, %cst_36 {dimension_numbers = #tpu.dot_dimension_numbers<[1], [0], [0], [1], [0, 0, 1, 1], [], []>} : vector<16x128xbf16>, vector<128x128xbf16>, vector<16x128xf32> -> vector<16x128xf32>
    %c0_37 = arith.constant 0 : index
    %c0_38 = arith.constant 0 : index
    %c0_39 = arith.constant 0 : index
    %91 = vector.load %arg8[%c0_37, %c0_38, %c0_39] : memref<1x1x128xf32, #tpu.memory_space<vmem>>, vector<1x1x128xf32>
    %92 = vector.shape_cast %91 : vector<1x1x128xf32> to vector<1x128xf32>
    %93 = vector.broadcast %92 : vector<1x128xf32> to vector<16x128xf32>
    %94 = arith.addf %90, %93 : vector<16x128xf32>
    %95 = arith.addf %3, %94 : vector<16x128xf32>
    %c0_40 = arith.constant 0 : index
    %c0_41 = arith.constant 0 : index
    %c0_42 = arith.constant 0 : index
    %96 = vector.load %arg9[%c0_40, %c0_41, %c0_42] : memref<1x1x128xf32, #tpu.memory_space<vmem>>, vector<1x1x128xf32>
    %97 = vector.shape_cast %96 : vector<1x1x128xf32> to vector<1x128xf32>
    %c0_43 = arith.constant 0 : index
    %c0_44 = arith.constant 0 : index
    %c0_45 = arith.constant 0 : index
    %98 = vector.load %arg10[%c0_43, %c0_44, %c0_45] : memref<1x1x128xf32, #tpu.memory_space<vmem>>, vector<1x1x128xf32>
    %99 = vector.shape_cast %98 : vector<1x1x128xf32> to vector<1x128xf32>
    %cst_46 = arith.constant dense<0.000000e+00> : vector<16xf32>
    %100 = vector.multi_reduction <add>, %95, %cst_46 [1] : vector<16x128xf32> to vector<16xf32>
    %101 = vector.shape_cast %100 : vector<16xf32> to vector<16x1xf32>
    %cst_47 = arith.constant 1.280000e+02 : f32
    %102 = vector.broadcast %cst_47 : f32 to vector<16x1xf32>
    %103 = arith.divf %101, %102 : vector<16x1xf32>
    %104 = vector.broadcast %103 : vector<16x1xf32> to vector<16x128xf32>
    %105 = arith.subf %95, %104 : vector<16x128xf32>
    %106 = vector.broadcast %103 : vector<16x1xf32> to vector<16x128xf32>
    %107 = arith.subf %95, %106 : vector<16x128xf32>
    %108 = arith.mulf %105, %107 : vector<16x128xf32>
    %cst_48 = arith.constant dense<0.000000e+00> : vector<16xf32>
    %109 = vector.multi_reduction <add>, %108, %cst_48 [1] : vector<16x128xf32> to vector<16xf32>
    %110 = vector.shape_cast %109 : vector<16xf32> to vector<16x1xf32>
    %cst_49 = arith.constant 1.280000e+02 : f32
    %111 = vector.broadcast %cst_49 : f32 to vector<16x1xf32>
    %112 = arith.divf %110, %111 : vector<16x1xf32>
    %113 = vector.broadcast %103 : vector<16x1xf32> to vector<16x128xf32>
    %114 = arith.subf %95, %113 : vector<16x128xf32>
    %cst_50 = arith.constant 9.99999996E-13 : f32
    %115 = vector.broadcast %cst_50 : f32 to vector<16x1xf32>
    %116 = arith.addf %112, %115 : vector<16x1xf32>
    %117 = math.rsqrt %116 : vector<16x1xf32>
    %118 = vector.broadcast %117 : vector<16x1xf32> to vector<16x128xf32>
    %119 = arith.mulf %114, %118 : vector<16x128xf32>
    %120 = vector.broadcast %97 : vector<1x128xf32> to vector<16x128xf32>
    %121 = arith.mulf %119, %120 : vector<16x128xf32>
    %122 = vector.broadcast %99 : vector<1x128xf32> to vector<16x128xf32>
    %123 = arith.addf %121, %122 : vector<16x128xf32>
    %124 = arith.truncf %123 : vector<16x128xf32> to vector<16x128xbf16>
    %c0_51 = arith.constant 0 : index
    %c0_52 = arith.constant 0 : index
    %c0_53 = arith.constant 0 : index
    %125 = vector.load %arg11[%c0_51, %c0_52, %c0_53] : memref<1x128x512xbf16, #tpu.memory_space<vmem>>, vector<1x128x512xbf16>
    %126 = vector.shape_cast %125 : vector<1x128x512xbf16> to vector<128x512xbf16>
    %cst_54 = arith.constant dense<0.000000e+00> : vector<16x512xf32>
    %127 = tpu.matmul %124, %126, %cst_54 {dimension_numbers = #tpu.dot_dimension_numbers<[1], [0], [0], [1], [0, 0, 1, 1], [], []>} : vector<16x128xbf16>, vector<128x512xbf16>, vector<16x512xf32> -> vector<16x512xf32>
    %c0_55 = arith.constant 0 : index
    %c0_56 = arith.constant 0 : index
    %c0_57 = arith.constant 0 : index
    %128 = vector.load %arg12[%c0_55, %c0_56, %c0_57] : memref<1x1x512xf32, #tpu.memory_space<vmem>>, vector<1x1x512xf32>
    %129 = vector.shape_cast %128 : vector<1x1x512xf32> to vector<1x512xf32>
    %130 = vector.broadcast %129 : vector<1x512xf32> to vector<16x512xf32>
    %131 = arith.addf %127, %130 : vector<16x512xf32>
    %cst_58 = arith.constant 5.000000e-01 : f32
    %132 = vector.broadcast %cst_58 : f32 to vector<16x512xf32>
    %133 = arith.mulf %132, %131 : vector<16x512xf32>
    %cst_59 = arith.constant 4.471500e-02 : f32
    %134 = vector.broadcast %cst_59 : f32 to vector<16x512xf32>
    %135 = arith.mulf %134, %131 : vector<16x512xf32>
    %136 = arith.mulf %135, %131 : vector<16x512xf32>
    %137 = arith.mulf %136, %131 : vector<16x512xf32>
    %138 = arith.addf %131, %137 : vector<16x512xf32>
    %cst_60 = arith.constant 0.797884583 : f32
    %139 = vector.broadcast %cst_60 : f32 to vector<16x512xf32>
    %140 = arith.mulf %139, %138 : vector<16x512xf32>
    %141 = math.tanh %140 : vector<16x512xf32>
    %cst_61 = arith.constant 1.000000e+00 : f32
    %142 = vector.broadcast %cst_61 : f32 to vector<16x512xf32>
    %143 = arith.addf %142, %141 : vector<16x512xf32>
    %144 = arith.mulf %133, %143 : vector<16x512xf32>
    %145 = arith.truncf %144 : vector<16x512xf32> to vector<16x512xbf16>
    %c0_62 = arith.constant 0 : index
    %c0_63 = arith.constant 0 : index
    %c0_64 = arith.constant 0 : index
    %146 = vector.load %arg13[%c0_62, %c0_63, %c0_64] : memref<1x512x128xbf16, #tpu.memory_space<vmem>>, vector<1x512x128xbf16>
    %147 = vector.shape_cast %146 : vector<1x512x128xbf16> to vector<512x128xbf16>
    %cst_65 = arith.constant dense<0.000000e+00> : vector<16x128xf32>
    %148 = tpu.matmul %145, %147, %cst_65 {dimension_numbers = #tpu.dot_dimension_numbers<[1], [0], [0], [1], [0, 0, 1, 1], [], []>} : vector<16x512xbf16>, vector<512x128xbf16>, vector<16x128xf32> -> vector<16x128xf32>
    %c0_66 = arith.constant 0 : index
    %c0_67 = arith.constant 0 : index
    %c0_68 = arith.constant 0 : index
    %149 = vector.load %arg14[%c0_66, %c0_67, %c0_68] : memref<1x1x128xf32, #tpu.memory_space<vmem>>, vector<1x1x128xf32>
    %150 = vector.shape_cast %149 : vector<1x1x128xf32> to vector<1x128xf32>
    %151 = vector.broadcast %150 : vector<1x128xf32> to vector<16x128xf32>
    %152 = arith.addf %148, %151 : vector<16x128xf32>
    %153 = arith.addf %123, %152 : vector<16x128xf32>
    %c0_69 = arith.constant 0 : index
    %c0_70 = arith.constant 0 : index
    %c0_71 = arith.constant 0 : index
    %154 = vector.load %arg15[%c0_69, %c0_70, %c0_71] : memref<1x1x128xf32, #tpu.memory_space<vmem>>, vector<1x1x128xf32>
    %155 = vector.shape_cast %154 : vector<1x1x128xf32> to vector<1x128xf32>
    %c0_72 = arith.constant 0 : index
    %c0_73 = arith.constant 0 : index
    %c0_74 = arith.constant 0 : index
    %156 = vector.load %arg16[%c0_72, %c0_73, %c0_74] : memref<1x1x128xf32, #tpu.memory_space<vmem>>, vector<1x1x128xf32>
    %157 = vector.shape_cast %156 : vector<1x1x128xf32> to vector<1x128xf32>
    %cst_75 = arith.constant dense<0.000000e+00> : vector<16xf32>
    %158 = vector.multi_reduction <add>, %153, %cst_75 [1] : vector<16x128xf32> to vector<16xf32>
    %159 = vector.shape_cast %158 : vector<16xf32> to vector<16x1xf32>
    %cst_76 = arith.constant 1.280000e+02 : f32
    %160 = vector.broadcast %cst_76 : f32 to vector<16x1xf32>
    %161 = arith.divf %159, %160 : vector<16x1xf32>
    %162 = vector.broadcast %161 : vector<16x1xf32> to vector<16x128xf32>
    %163 = arith.subf %153, %162 : vector<16x128xf32>
    %164 = vector.broadcast %161 : vector<16x1xf32> to vector<16x128xf32>
    %165 = arith.subf %153, %164 : vector<16x128xf32>
    %166 = arith.mulf %163, %165 : vector<16x128xf32>
    %cst_77 = arith.constant dense<0.000000e+00> : vector<16xf32>
    %167 = vector.multi_reduction <add>, %166, %cst_77 [1] : vector<16x128xf32> to vector<16xf32>
    %168 = vector.shape_cast %167 : vector<16xf32> to vector<16x1xf32>
    %cst_78 = arith.constant 1.280000e+02 : f32
    %169 = vector.broadcast %cst_78 : f32 to vector<16x1xf32>
    %170 = arith.divf %168, %169 : vector<16x1xf32>
    %171 = vector.broadcast %161 : vector<16x1xf32> to vector<16x128xf32>
    %172 = arith.subf %153, %171 : vector<16x128xf32>
    %cst_79 = arith.constant 9.99999996E-13 : f32
    %173 = vector.broadcast %cst_79 : f32 to vector<16x1xf32>
    %174 = arith.addf %170, %173 : vector<16x1xf32>
    %175 = math.rsqrt %174 : vector<16x1xf32>
    %176 = vector.broadcast %175 : vector<16x1xf32> to vector<16x128xf32>
    %177 = arith.mulf %172, %176 : vector<16x128xf32>
    %178 = vector.broadcast %155 : vector<1x128xf32> to vector<16x128xf32>
    %179 = arith.mulf %177, %178 : vector<16x128xf32>
    %180 = vector.broadcast %157 : vector<1x128xf32> to vector<16x128xf32>
    %181 = arith.addf %179, %180 : vector<16x128xf32>
    %c0_80 = arith.constant 0 : index
    %c0_81 = arith.constant 0 : index
    %182 = vector.load %arg22[%c0_80, %c0_81] : memref<16x128xf32, #tpu.memory_space<vmem>>, vector<16x128xf32>
    tpu.vector_store %arg22[%c0_80, %c0_81], %181 {strides = array<i32>} : memref<16x128xf32, #tpu.memory_space<vmem>>, vector<16x128xf32>,
    %c1_i32 = arith.constant 1 : i32
    %183 = arith.cmpi eq, %arg0, %c1_i32 : i32
    %184 = arith.extui %183 : i1 to i32
    %c0_i32_82 = arith.constant 0 : i32
    %185 = arith.cmpi ne, %184, %c0_i32_82 : i32
    scf.if %185 {
      %186 = vector.extract_strided_slice %181 {offsets = [0, 0], sizes = [2, 128], strides = [1, 1]} : vector<16x128xf32> to vector<2x128xf32>
      %187 = arith.truncf %186 : vector<2x128xf32> to vector<2x128xbf16>
      %c0_83 = arith.constant 0 : index
      %c0_84 = arith.constant 0 : index
      %188 = vector.load %arg17[%c0_83, %c0_84] : memref<128x128xbf16, #tpu.memory_space<vmem>>, vector<128x128xbf16>
      %cst_85 = arith.constant dense<0.000000e+00> : vector<2x128xf32>
      %189 = tpu.matmul %187, %188, %cst_85 {dimension_numbers = #tpu.dot_dimension_numbers<[1], [0], [0], [1], [0, 0, 1, 1], [], []>} : vector<2x128xbf16>, vector<128x128xbf16>, vector<2x128xf32> -> vector<2x128xf32>
      %c0_86 = arith.constant 0 : index
      %c0_87 = arith.constant 0 : index
      %190 = vector.load %arg18[%c0_86, %c0_87] : memref<1x128xf32, #tpu.memory_space<vmem>>, vector<1x128xf32>
      %191 = vector.broadcast %190 : vector<1x128xf32> to vector<2x128xf32>
      %192 = arith.addf %189, %191 : vector<2x128xf32>
      %193 = math.tanh %192 : vector<2x128xf32>
      %c0_88 = arith.constant 0 : index
      %c0_89 = arith.constant 0 : index
      %194 = vector.load %arg19[%c0_88, %c0_89] : memref<128x1xf32, #tpu.memory_space<vmem>>, vector<128x1xf32>
      %cst_90 = arith.constant dense<0.000000e+00> : vector<2x1xf32>
      %195 = tpu.matmul %193, %194, %cst_90 {dimension_numbers = #tpu.dot_dimension_numbers<[1], [0], [0], [1], [0, 0, 1, 1], [], []>} : vector<2x128xf32>, vector<128x1xf32>, vector<2x1xf32> -> vector<2x1xf32>
      %c0_91 = arith.constant 0 : index
      %c0_92 = arith.constant 0 : index
      %196 = vector.load %arg20[%c0_91, %c0_92] : memref<1x1xf32, #tpu.memory_space<vmem>>, vector<1x1xf32>
      %197 = vector.broadcast %196 : vector<1x1xf32> to vector<2x1xf32>
      %198 = arith.addf %195, %197 : vector<2x1xf32>
      %c0_93 = arith.constant 0 : index
      %c0_94 = arith.constant 0 : index
      %199 = vector.load %arg21[%c0_93, %c0_94] : memref<2x1xf32, #tpu.memory_space<vmem>>, vector<2x1xf32>
      tpu.vector_store %arg21[%c0_93, %c0_94], %198 {strides = array<i32>} : memref<2x1xf32, #tpu.memory_space<vmem>>, vector<2x1xf32>,
    } else {
    }
    return
  }
  func.func @transform_0(%arg0: i32) -> (i32, i32) {
    %c0_i32 = arith.constant 0 : i32
    %c0_i32_0 = arith.constant 0 : i32
    %c0_i32_1 = arith.constant 0 : i32
    return %c0_i32, %c0_i32_0 : i32, i32
  }
  func.func @transform_1(%arg0: i32) -> (i32, i32) {
    %c0_i32 = arith.constant 0 : i32
    %c0_i32_0 = arith.constant 0 : i32
    %c0_i32_1 = arith.constant 0 : i32
    return %c0_i32, %c0_i32_0 : i32, i32
  }
  func.func @transform_2(%arg0: i32) -> (i32, i32) {
    %c0_i32 = arith.constant 0 : i32
    %c0_i32_0 = arith.constant 0 : i32
    %c0_i32_1 = arith.constant 0 : i32
    return %c0_i32, %c0_i32_0 : i32, i32
  }
  func.func @transform_3(%arg0: i32) -> (i32, i32) {
    %c0_i32 = arith.constant 0 : i32
    %c0_i32_0 = arith.constant 0 : i32
    %c0_i32_1 = arith.constant 0 : i32
    return %c0_i32, %c0_i32_0 : i32, i32
  }
  func.func @transform_4(%arg0: i32) -> (i32, i32, i32) {
    %c0_i32 = arith.constant 0 : i32
    %c0_i32_0 = arith.constant 0 : i32
    %c0_i32_1 = arith.constant 0 : i32
    return %arg0, %c0_i32, %c0_i32_0 : i32, i32, i32
  }
  func.func @transform_5(%arg0: i32) -> (i32, i32, i32) {
    %c0_i32 = arith.constant 0 : i32
    %c0_i32_0 = arith.constant 0 : i32
    %c0_i32_1 = arith.constant 0 : i32
    return %arg0, %c0_i32, %c0_i32_0 : i32, i32, i32
  }
  func.func @transform_6(%arg0: i32) -> (i32, i32, i32) {
    %c0_i32 = arith.constant 0 : i32
    %c0_i32_0 = arith.constant 0 : i32
    %c0_i32_1 = arith.constant 0 : i32
    return %arg0, %c0_i32, %c0_i32_0 : i32, i32, i32
  }
  func.func @transform_7(%arg0: i32) -> (i32, i32, i32) {
    %c0_i32 = arith.constant 0 : i32
    %c0_i32_0 = arith.constant 0 : i32
    %c0_i32_1 = arith.constant 0 : i32
    return %arg0, %c0_i32, %c0_i32_0 : i32, i32, i32
  }
  func.func @transform_8(%arg0: i32) -> (i32, i32, i32) {
    %c0_i32 = arith.constant 0 : i32
    %c0_i32_0 = arith.constant 0 : i32
    %c0_i32_1 = arith.constant 0 : i32
    return %arg0, %c0_i32, %c0_i32_0 : i32, i32, i32
  }
  func.func @transform_9(%arg0: i32) -> (i32, i32, i32) {
    %c0_i32 = arith.constant 0 : i32
    %c0_i32_0 = arith.constant 0 : i32
    %c0_i32_1 = arith.constant 0 : i32
    return %arg0, %c0_i32, %c0_i32_0 : i32, i32, i32
  }
  func.func @transform_10(%arg0: i32) -> (i32, i32, i32) {
    %c0_i32 = arith.constant 0 : i32
    %c0_i32_0 = arith.constant 0 : i32
    %c0_i32_1 = arith.constant 0 : i32
    return %arg0, %c0_i32, %c0_i32_0 : i32, i32, i32
  }
  func.func @transform_11(%arg0: i32) -> (i32, i32, i32) {
    %c0_i32 = arith.constant 0 : i32
    %c0_i32_0 = arith.constant 0 : i32
    %c0_i32_1 = arith.constant 0 : i32
    return %arg0, %c0_i32, %c0_i32_0 : i32, i32, i32
  }
  func.func @transform_12(%arg0: i32) -> (i32, i32, i32) {
    %c0_i32 = arith.constant 0 : i32
    %c0_i32_0 = arith.constant 0 : i32
    %c0_i32_1 = arith.constant 0 : i32
    return %arg0, %c0_i32, %c0_i32_0 : i32, i32, i32
  }
  func.func @transform_13(%arg0: i32) -> (i32, i32, i32) {
    %c0_i32 = arith.constant 0 : i32
    %c0_i32_0 = arith.constant 0 : i32
    %c0_i32_1 = arith.constant 0 : i32
    return %arg0, %c0_i32, %c0_i32_0 : i32, i32, i32
  }
  func.func @transform_14(%arg0: i32) -> (i32, i32, i32) {
    %c0_i32 = arith.constant 0 : i32
    %c0_i32_0 = arith.constant 0 : i32
    %c0_i32_1 = arith.constant 0 : i32
    return %arg0, %c0_i32, %c0_i32_0 : i32, i32, i32
  }
  func.func @transform_15(%arg0: i32) -> (i32, i32, i32) {
    %c0_i32 = arith.constant 0 : i32
    %c0_i32_0 = arith.constant 0 : i32
    %c0_i32_1 = arith.constant 0 : i32
    return %arg0, %c0_i32, %c0_i32_0 : i32, i32, i32
  }
  func.func @transform_16(%arg0: i32) -> (i32, i32) {
    %c0_i32 = arith.constant 0 : i32
    %c0_i32_0 = arith.constant 0 : i32
    %c0_i32_1 = arith.constant 0 : i32
    return %c0_i32, %c0_i32_0 : i32, i32
  }
  func.func @transform_17(%arg0: i32) -> (i32, i32) {
    %c0_i32 = arith.constant 0 : i32
    %c0_i32_0 = arith.constant 0 : i32
    %c0_i32_1 = arith.constant 0 : i32
    return %c0_i32, %c0_i32_0 : i32, i32
  }
  func.func @transform_18(%arg0: i32) -> (i32, i32) {
    %c0_i32 = arith.constant 0 : i32
    %c0_i32_0 = arith.constant 0 : i32
    %c0_i32_1 = arith.constant 0 : i32
    return %c0_i32, %c0_i32_0 : i32, i32
  }
  func.func @transform_19(%arg0: i32) -> (i32, i32) {
    %c0_i32 = arith.constant 0 : i32
    %c0_i32_0 = arith.constant 0 : i32
    %c0_i32_1 = arith.constant 0 : i32
    return %c0_i32, %c0_i32_0 : i32, i32
  }
  func.func @transform_20(%arg0: i32) -> (i32, i32) {
    %c0_i32 = arith.constant 0 : i32
    %c0_i32_0 = arith.constant 0 : i32
    %c0_i32_1 = arith.constant 0 : i32
    return %c0_i32, %c0_i32_0 : i32, i32
  }
}

</mosaic_0001>

<bundles_post_ra>
// kernel: bert_forward.1
= control target key start
LH: loop header
LB: loop body
LE: loop exit
PB: predicated region body
PF: predicated region fallthrough
CT: control target
= control target key end

     0   :  { %s4159_s0 = inlined_call_operand.vmem [shape: f32[16,128], index: 0, kind: input, shape index: {}]   ;;  %s4160_s1 = inlined_call_operand.vmem [shape: f32[16,16], index: 1, kind: input, shape index: {}]   ;;  %s4161_s2 = inlined_call_operand.vmem [shape: f32[1,128], index: 2, kind: input, shape index: {}]   ;;  %s4162_s3 = inlined_call_operand.vmem [shape: f32[1,128], index: 3, kind: input, shape index: {}]   ;;  %s4163_s4 = inlined_call_operand.vmem [shape: bf16[2,128,384], index: 4, kind: input, shape index: {}]   ;;  %s4164_s5 = inlined_call_operand.vmem [shape: f32[2,1,384], index: 5, kind: input, shape index: {}]   ;;  %s4165_s6 = inlined_call_operand.vmem [shape: bf16[2,128,128], index: 6, kind: input, shape index: {}]   ;;  %s4166_s7 = inlined_call_operand.vmem [shape: f32[2,1,128], index: 7, kind: input, shape index: {}]   ;;  %s4167_s8 = inlined_call_operand.vmem [shape: f32[2,1,128], index: 8, kind: input, shape index: {}]   ;;  %s4168_s9 = inlined_call_operand.vmem [shape: f32[2,1,128], index: 9, kind: input, shape index: {}]   ;;  %s4169_s10 = inlined_call_operand.hbm [shape: bf16[2,128,512], index: 10, kind: input, shape index: {}]   ;;  %s4170_s11 = inlined_call_operand.vmem [shape: f32[2,1,512], index: 11, kind: input, shape index: {}]   ;;  %s4171_s12 = inlined_call_operand.hbm [shape: bf16[2,512,128], index: 12, kind: input, shape index: {}]   ;;  %s4172_s13 = inlined_call_operand.vmem [shape: f32[2,1,128], index: 13, kind: input, shape index: {}]   ;;  %s4173_s14 = inlined_call_operand.vmem [shape: f32[2,1,128], index: 14, kind: input, shape index: {}]   ;;  %s4174_s15 = inlined_call_operand.vmem [shape: f32[2,1,128], index: 15, kind: input, shape index: {}]   ;;  %s4175_s16 = inlined_call_operand.vmem [shape: bf16[128,128], index: 16, kind: input, shape index: {}]   ;;  %s4176_s17 = inlined_call_operand.hbm [shape: f32[1,128], index: 17, kind: input, shape index: {}]   ;;  %s4177_s18 = inlined_call_operand.vmem [shape: f32[128,1], index: 18, kind: input, shape index: {}]   ;;  %s4178_s19 = inlined_call_operand.<no memory space> [shape: f32[1,1], index: 19, kind: input, shape index: {}]   ;;  %s4179_s20 = inlined_call_operand.vmem [shape: f32[2,1], index: 20, kind: output, shape index: {}]  }
   0x1   :  { %4187 = sst [smem:[#allocation16_spill]] %s4159_s0  ;;  %v25_v0 = vstv %s4178_s19 }
   0x2   :  { %4188 = sst [smem:[#allocation17_spill]] %s4160_s1  ;;  %26 = vst [vmem:[#allocation4] sm:$0x1] %v25_v0 }
   0x3   :  { %4189 = sst [smem:[#allocation18_spill]] %s4161_s2 }
   0x4   :  { %4190 = sst [smem:[#allocation19_spill]] %s4162_s3 }
   0x5   :  { %4191 = sst [smem:[#allocation20_spill]] %s4163_s4 }
   0x6   :  { %4192 = sst [smem:[#allocation21_spill]] %s4164_s5 }
   0x7   :  { %4193 = sst [smem:[#allocation22_spill]] %s4165_s6 }
   0x8   :  { %4194 = sst [smem:[#allocation23_spill]] %s4169_s10 }
   0x9   :  { %4195 = sst [smem:[#allocation24_spill]] %s4171_s12 }
   0xa   :  { %4196 = sst [smem:[#allocation25_spill]] %s4173_s14 }
   0xb   :  { %4197 = sst [smem:[#allocation26_spill]] %s4174_s15 }
   0xc   :  { %4198 = sst [smem:[#allocation27_spill]] %s4175_s16 }
   0xd   :  { %4199 = sst [smem:[#allocation28_spill]] %s4176_s17 }
   0xe   :  { %4200 = sst [smem:[#allocation29_spill]] %s4177_s18 }
   0xf   :  { %4201 = sst [smem:[#allocation30_spill]] %s4179_s20 }
  0x10   :  { %27 = vsyncpa [#allocation6], 0 }
  0x11   :  { %29 = vsyncpa [#allocation6 + $0x1], 0 }
  0x12   :  { %30 = vsyncpa [#allocation8], 0 }
  0x13   :  { %32 = vsyncpa [#allocation8 + $0x1], 0  ;;  %s3554_s23 = smov 0   ;;  %s3556_s24 = smov 0  }
  0x14   :  { %s3558_s2 = smov 0   ;;  %s3560_s25 = smov 0  }
  0x15 LB: > { %4202 = sst [smem:[#allocation13_spill]] %s3430_s2  ;;  %s3573_s19 = sadd.s32 4294967295, %s3434_s25   ;;  %s3434_s25 = sphi %s3560_s25, %s4229_s25   ;;  %s3430_s2 = sphi %s3558_s2, %s4231_s2   ;;  %s3426_s24 = sphi %s3556_s24, %s4233_s24   ;;  %s3422_s23 = sphi %s3554_s23, %s4232_s23  }
  0x16   : > { %s3576_s3 = sadd.s32 1, %s3434_s25   ;;  %s285_s27 = sadd.s32 1, %s3430_s2 }
  0x17   : > { %4203 = sst [smem:[#allocation14_spill]] %s3576_s3  ;;  %s282_s26 = ssub.s32 %s3434_s25, %s3576_s3 }
  0x18   : > { %p283_p0 = scmp.eq.s32.totalorder %s282_s26, 0  ;;  %p292_p1 = scmp.ne.s32.totalorder %s3430_s2, %s3426_s24 }
  0x19   : > { %p293_p2 = scmp.eq.s32.totalorder %s3434_s25, 0  ;;  %p298_p3 = scmp.ne.s32.totalorder %s3426_s24, %s3422_s23 }
  0x1a   : > { %s3586_s28 = scalar_select %p283_p0, %s3430_s2, %s285_s27  }
  0x1b   : > { %p3588_p4 = por %p293_p2, %p292_p1  ;;  %p299_p5 = scmp.eq.s32.totalorder %s3573_s19, 0 }
  0x1c   : > { %4204 = sst [smem:[#allocation15_spill]] %s3586_s28  ;;  %p2608_p6 = scmp.ge.s32.totalorder %s3434_s25, 1 }
  0x1d   : > { %p544_p7 = scmp.lt.s32.totalorder %s3434_s25, 3  ;;  %p3597_p8 = por %p299_p5, %p298_p3 }
  0x1e   : > { %p2609_p9 = scmp.ne.s32.totalorder %s3573_s19, 0  ;;  %s4208_s17 = sld [smem:[#allocation28_spill]] }
  0x1f   : > { %p3602_p10 = pnand %p2608_p6, %p544_p7  ;;  %s3436_s22 = smov [#allocation9]  }
  0x20   : > { %s573_s23 = sshll.u32 %s3436_s22, 4  ;;  %p3182_p13 = scmp.lt.s32.totalorder %s3434_s25, 2  ;;  %s574_s23 = int_to_ptr.vmem [resolvable:$true] %s573_s23 }
  0x21   : > { %p3170_p11 = pneg %p3602_p10  ;;  %s631_s26 = sand.u32 1, %s3430_s2  }
  0x22   : > { %s3053_s27 = sshll.u32 %s3434_s25, 8  ;;  %p3618_p0 = pnand %p3182_p13, %p3588_p4 }
  0x23   : > { %p3171_p12 = pnand %p3170_p11, %p299_p5  ;;  %s2611_s0 = sshll.u32 %s631_s26, 8 }
  0x24   : > { %s571_s1 = sshll.u32 %s4208_s17, 4  ;;  %s4210_s10 = sld [smem:[#allocation23_spill]]  ;;  %s572_s1 = int_to_ptr.hbm [resolvable:$true] %s571_s1 }
  0x25   : > { %3173 = dma.hbm_to_vmem [thread:$0]  (!%p3171_p12), %s572_s1, 16, %s574_s23, [#allocation8]  }
  0x26   : > { %s635_s20 = scalar_lea.vmem [#allocation5], %s2611_s0  ;;  %s632_s2 = scalar_lea.sflag [#allocation6], %s631_s26 }
  0x27   : > { %s643_s18 = sshll.u32 %s635_s20, 4  ;;  %p3336_p2 = pneg %p3618_p0  ;;  %s644_s18 = int_to_ptr.vmem [resolvable:$true] %s643_s18 }
  0x2a   : > { %s640_s22 = scalar_lea.hbm %s4210_s10, %s3053_s27  ;;  %s3339_s17 = scalar_lea.hbm %s4210_s10, 512 }
  0x2b   : > { %s641_s3 = sshll.u32 %s640_s22, 4  ;;  %s642_s3 = int_to_ptr.hbm [resolvable:$true] %s641_s3 }
  0x2c   : > { %s3332_s4 = sshra.s32 %s642_s3, 4  ;;  %s3333_s4 = int_to_ptr.hbm [resolvable:$true] %s3332_s4 }
  0x2d   : > { %s3334_s16 = scalar_lea.hbm %s3333_s4, 256  ;;  %p3340_p6 = scmp.lt.s32.totalorder %s3333_s4, %s4210_s10 }
  0x2e   : > { %p3335_p1 = scmp.ne.s32.totalorder %s3333_s4, %s3334_s16  ;;  %p3341_p7 = scmp.lt.s32.totalorder %s3339_s17, %s3334_s16 }
  0x30   : > { %p3337_p3 = pnand %p3336_p2, %p3335_p1  ;;  %p3342_p11 = por %p3341_p7, %p3340_p6 }
  0x32   : > { %p3338_p4 = pneg %p3337_p3 }
  0x34   : > { %p3343_p12 = pnand %p3342_p11, %p3338_p4 }
  0x36   : > { %3346 = shalt.err (!%p3343_p12)
}
  0x37   : > { %s3437_s20 = smov 256   ;;  %s3438_s26 = smov 16  }
  0x38   : > { %3177 = dma.hbm_to_vmem [thread:$0]  (!%p3618_p0), %s642_s3, 4096, %s644_s18, %s632_s2, %s3437_s20, %s3437_s20, %s3438_s26  }
  0x39   : > { %s4211_s12 = sld [smem:[#allocation24_spill]]  ;;  %s664_s14 = scalar_lea.vmem [#allocation7], %s2611_s0 }
  0x3a   : > { %s672_s21 = sshll.u32 %s664_s14, 4  ;;  %s660_s16 = sand.u32 1, %s3434_s25   ;;  %s673_s21 = int_to_ptr.vmem [resolvable:$true] %s672_s21 }
  0x3b   : > { %s661_s17 = scalar_lea.sflag [#allocation8], %s660_s16 }
  0x3f   : > { %s669_s23 = scalar_lea.hbm %s4211_s12, %s3053_s27  ;;  %s3369_s15 = scalar_lea.hbm %s4211_s12, 512 }
  0x40   : > { %s670_s4 = sshll.u32 %s669_s23, 4  ;;  %s671_s4 = int_to_ptr.hbm [resolvable:$true] %s670_s4 }
  0x41   : > { %s3362_s22 = sshra.s32 %s671_s4, 4  ;;  %s3363_s22 = int_to_ptr.hbm [resolvable:$true] %s3362_s22 }
  0x42   : > { %s3364_s10 = scalar_lea.hbm %s3363_s22, 256  ;;  %p3370_p4 = scmp.lt.s32.totalorder %s3363_s22, %s4211_s12 }
  0x43   : > { %p3365_p13 = scmp.ne.s32.totalorder %s3363_s22, %s3364_s10  ;;  %p3371_p6 = scmp.lt.s32.totalorder %s3369_s15, %s3364_s10 }
  0x45   : > { %p3367_p1 = pnand %p3365_p13, %p3336_p2  ;;  %p3372_p7 = por %p3371_p6, %p3370_p4 }
  0x47   : > { %p3368_p3 = pneg %p3367_p1 }
  0x49   : > { %p3373_p11 = pnand %p3372_p7, %p3368_p3 }
  0x4b   : > { %3376 = shalt.err (!%p3373_p11)
}
  0x4c   : > { %s3439_s14 = smov 64   ;;  %s3440_s25 = smov 4  }
  0x4d   : > { %3180 = dma.hbm_to_vmem [thread:$0]  (!%p3618_p0), %s671_s4, 4096, %s673_s21, %s661_s17, %s3439_s14, %s3439_s14, %s3440_s25  }
  0x4e   : > { %702 = sbr.rel (%p3602_p10) target bundleno = 2952 (0xb88), region = 100  ;;  %s704_s0 = sand.u32 (!%p3602_p10), 1, %s3426_s24  }
  0x4f   : > { %s2618_s20 = sshll.u32 (!%p3602_p10), %s704_s0, 8  ;;  %s705_s26 = scalar_lea.sflag (!%p3602_p10), [#allocation6], %s704_s0 }
  0x50   : > { %s3660_s1 = scalar_lea.vmem (!%p3602_p10), [#allocation5], %s2618_s20 }
  0x53   : > { %3409 = dma.done.wait (%p3597_p8), %s705_s26, 4096  }
  0x54   : > { %3411 = vsyncadd (%p3597_p8), %s705_s26, 4294963200  ;;  %s714_s10 = sand.u32 1, %s3573_s19   ;;  %s3667_s23 = scalar_lea.vmem [#allocation7], %s2618_s20 }
  0x55   : > { %s715_s28 = scalar_lea.sflag [#allocation8], %s714_s10 }
  0x56   : > { %3413 = dma.done.wait (%p3597_p8), %s715_s28, 4096  }
  0x57   : > { %3415 = vsyncadd (%p3597_p8), %s715_s28, 4294963200 }
  0x58   : > { %3417 = dma.done.wait (%p299_p5), [#allocation8], 16  }
  0x59   : > { %3419 = vsyncadd (%p299_p5), [#allocation8], 4294967280  ;;  %p817_p10 = scmp.lt.s32.totalorder %s3573_s19, 1  ;;  %s4212_s6 = sld [smem:[#allocation22_spill]] }
  0x5a   : > { %s4213_s15 = sld [smem:[#allocation20_spill]] }
  0x5b   : > { %s3679_s30 = scalar_select %p817_p10, %s3573_s19, 1 }
  0x5c   : > { %s4214_s5 = sld [smem:[#allocation21_spill]] }
  0x5d   : > { %s3160_s29 = smul.u32 192, %s3679_s30  ;;  %s3055_s21 = sshll.u32 %s3679_s30, 6 }
  0x5e   : > { %s3161_s4 = smul.u32 3, %s3679_s30  ;;  %s2624_s18 = sshll.u32 %s3679_s30, 2 }
  0x5f   : > { %s3687_s22 = scalar_lea.vmem %s4212_s6, %s3055_s21  ;;  %s839_s6 = scalar_lea.vmem %s4168_s9, %s3679_s30 }
  0x60   : > { %s3692_s3 = scalar_lea.vmem %s4213_s15, %s3160_s29  ;;  %s3715_s15 = scalar_lea.vmem %s4170_s11, %s2624_s18 }
  0x61   : > { %s846_s0 = scalar_lea.vmem %s4172_s13, %s3679_s30  ;;  %s4215_s25 = sld [smem:[#allocation25_spill]] }
  0x62   : > { %s3701_s26 = scalar_lea.vmem %s4214_s5, %s3161_s4  ;;  %s4216_s16 = sld [smem:[#allocation26_spill]] }
  0x63   : > { %s4217_s29 = sld [smem:[#allocation16_spill]] (!%p2609_p9) }
  0x64   : > { %857 = sbr.rel (%p2609_p9) target bundleno = 381 (0x17d), region = 116  ;;  %s4218_s27 = sld [smem:[#allocation18_spill]] (!%p2609_p9) }
  0x65   : > { %s4219_s20 = sld [smem:[#allocation19_spill]] (!%p2609_p9) }
  0x67   : > { %s849_s5 = scalar_lea.vmem %s4215_s25, %s3679_s30 }
  0x68   : > { %s852_s12 = scalar_lea.vmem %s4216_s16, %s3679_s30 }
  0x69   : > { %v858_v1 = vld [vmem:[%s4217_s29] sm:$0xff]  ;;  %v859_v2 = vld [vmem:[%s4217_s29 + $0x8] sm:$0xff]  ;;  %v3441_v3 = vmov 128.0  }
  0x6a   : > { %862 = vadd.xlane.f32.xlu0 %v858_v1  ;;  %3228 = vrcp.f32 %v3441_v3  ;;  %v3226_v32 = vld [vmem:[%s4218_s27] ss:$0 sm:$0xff] }
  0x6b   : > { %v3227_v35 = vld [vmem:[%s4219_s20] ss:$0 sm:$0xff] }
  0x70   : > { %v3229_v4 = vpop.eup %3228 }
  0x71   : > { %v867_v5 = vmul.f32 128.0, %v3229_v4  ;;  %vm871_vm0 = vweird.f32 %v3229_v4 }
  0x72   : > { %864 = vadd.xlane.f32.xlu0 %v859_v2 }
  0x73   : > { %v868_v6 = vsub.f32 1.0, %v867_v5 }
  0x75   : > { %v869_v7 = vmul.f32 %v3229_v4, %v868_v6 }
  0x77   : > { %v870_v8 = vadd.f32 %v3229_v4, %v869_v7 }
  0x79   : > { %v872_v9 = vsel %vm871_vm0, %v3229_v4, %v870_v8 }
  0xdd   : > { %v863_v10 = vpop.xlane.xlu0 %862 }
  0xde   : > { %v873_v11 = vmul.f32 %v872_v9, %v863_v10 }
  0xe0   : > { %v875_v12 = vsub.f32 %v858_v1, %v873_v11 }
  0xe2   : > { %v877_v13 = vmul.f32 %v875_v12, %v875_v12 }
  0xe4   : > { %879 = vadd.xlane.f32.xlu1 %v877_v13 }
  0xe5   : > { %v865_v14 = vpop.xlane.xlu0 %864 }
  0xe6   : > { %v874_v15 = vmul.f32 %v872_v9, %v865_v14 }
  0xe8   : > { %v876_v16 = vsub.f32 %v859_v2, %v874_v15 }
  0xea   : > { %v878_v17 = vmul.f32 %v876_v16, %v876_v16 }
  0xec   : > { %881 = vadd.xlane.f32.xlu1 %v878_v17 }
 0x157   : > { %v880_v18 = vpop.xlane.xlu1 %879 }
 0x158   : > { %v883_v19 = vmul.f32 %v880_v18, %v872_v9 }
 0x15a   : > { %v885_v20 = vadd.f32 1e-12, %v883_v19 }
 0x15c   : > { %3230 = vrsqrt.f32 %v885_v20  ;;  %vm893_vm2 = vweird.f32 %v885_v20 }
 0x15f   : > { %v882_v21 = vpop.xlane.xlu1 %881 }
 0x160   : > { %v884_v22 = vmul.f32 %v882_v21, %v872_v9 }
 0x162   : > { %v3231_v23 = vpop.eup %3230  ;;  %v886_v24 = vadd.f32 1e-12, %v884_v22 }
 0x163   : > { %v888_v25 = vmul.f32 %v3231_v23, %v885_v20  ;;  %vm894_vm1 = vweird.f32 %v3231_v23 }
 0x164   : > { %3232 = vrsqrt.f32 %v886_v24  ;;  %vm895_vm3 = vmor %vm893_vm2, %vm894_vm1  ;;  %vm903_vm5 = vweird.f32 %v886_v24 }
 0x165   : > { %v889_v26 = vmul.f32 %v3231_v23, %v888_v25 }
 0x167   : > { %v890_v27 = vmul.f32 0.5, %v889_v26 }
 0x169   : > { %v891_v28 = vsub.f32 1.5, %v890_v27 }
 0x16a   : > { %v3233_v29 = vpop.eup %3232 }
 0x16b   : > { %v892_v30 = vmul.f32 %v3231_v23, %v891_v28  ;;  %v898_v31 = vmul.f32 %v3233_v29, %v886_v24  ;;  %vm904_vm4 = vweird.f32 %v3233_v29 }
 0x16c   : > { %vm905_vm6 = vmor %vm903_vm5, %vm904_vm4 }
 0x16d   : > { %v896_v33 = vsel %vm895_vm3, %v3231_v23, %v892_v30  ;;  %v899_v34 = vmul.f32 %v3233_v29, %v898_v31 }
 0x16e   : > { %v907_v36 = vmul.f32 %v896_v33, %v875_v12 }
 0x16f   : > { %v900_v37 = vmul.f32 0.5, %v899_v34 }
 0x170   : > { %v912_v38 = vmul.f32 %v3226_v32, %v907_v36 }
 0x171   : > { %v901_v39 = vsub.f32 1.5, %v900_v37 }
 0x172   : > { %v917_v40 = vadd.f32 %v3227_v35, %v912_v38 }
 0x173   : > { %v902_v41 = vmul.f32 %v3233_v29, %v901_v39 }
 0x174   : > { %919 = vst [vmem:[#allocation2] sm:$0xff] %v917_v40 }
 0x175   : > { %v906_v42 = vsel %vm905_vm6, %v3233_v29, %v902_v41 }
 0x176   : > { %v908_v43 = vmul.f32 %v906_v42, %v876_v16 }
 0x178   : > { %v913_v44 = vmul.f32 %v3226_v32, %v908_v43 }
 0x17a   : > { %v918_v45 = vadd.f32 %v3227_v35, %v913_v44 }
 0x17c   : > { %920 = vst [vmem:[#allocation2 + $0x8] sm:$0xff] %v918_v45 }
 0x17d PF: > { %v2712_v46 = vld [vmem:[%s3692_s3 + $0xa8] sm:$0xf]  ;;  %v3078_v47 = vld [vmem:[%s3692_s3 + $0xb0] sm:$0xf0]  ;;  %v3077_v48 = vld [vmem:[%s3692_s3 + $0xac] sm:$0xf]  ;;  %s4221_s16 = scalar_lea.vmem %s4166_s7, %s3679_s30  ;;  %s4222_s14 = scalar_lea.vmem %s4167_s8, %s3679_s30 }
 0x17e   : > { %v2713_v49 = vor.u32 %v3078_v47, %v2712_v46  ;;  %v2714_v50 = vld [vmem:[%s3692_s3 + $0xb4] sm:$0xf0]  ;;  %v2700_v51 = vld [vmem:[%s3692_s3 + $0x90] sm:$0xf]  ;;  %v3075_v52 = vld [vmem:[%s3692_s3 + $0x98] sm:$0xf0] }
 0x17f   : > { %v2717_v53 = vor.u32 %v3077_v48, %v2714_v50  ;;  %v3074_v54 = vld [vmem:[%s3692_s3 + $0x94] sm:$0xf]  ;;  %v2702_v55 = vld [vmem:[%s3692_s3 + $0x9c] sm:$0xf0]  ;;  %v2701_v56 = vor.u32 %v3075_v52, %v2700_v51  ;;  %v2688_v58 = vld [vmem:[%s3692_s3 + $0x78] sm:$0xf] }
 0x180   : > { %1092 = vmatpush.bf16.msra.mxu0 %v2713_v49  ;;  %v2705_v57 = vor.u32 %v3074_v54, %v2702_v55  ;;  %v3072_v59 = vld [vmem:[%s3692_s3 + $0x80] sm:$0xf0]  ;;  %v3071_v60 = vld [vmem:[%s3692_s3 + $0x7c] sm:$0xf]  ;;  %v2690_v61 = vld [vmem:[%s3692_s3 + $0x84] sm:$0xf0] }
 0x181   : > { %1106 = vmatpush.bf16.msra.mxu1 %v2717_v53  ;;  %v2689_v62 = vor.u32 %v3072_v59, %v2688_v58  ;;  %v2693_v63 = vor.u32 %v3071_v60, %v2690_v61  ;;  %v2676_v0 = vld [vmem:[%s3692_s3 + $0x60] sm:$0xf]  ;;  %v3069_v1 = vld [vmem:[%s3692_s3 + $0x68] sm:$0xf0]  ;;  %v3068_v2 = vld [vmem:[%s3692_s3 + $0x64] sm:$0xf] }
 0x182   : > { %v2678_v3 = vld [vmem:[%s3692_s3 + $0x6c] sm:$0xf0]  ;;  %v2677_v4 = vor.u32 %v3069_v1, %v2676_v0  ;;  %v2664_v5 = vld [vmem:[%s3692_s3 + $0x48] sm:$0xf]  ;;  %v3079_v7 = vld [vmem:[%s3692_s3 + $0xb8] sm:$0xf0] }
 0x183   : > { %v2720_v6 = vld [vmem:[%s3692_s3 + $0xb0] sm:$0xf]  ;;  %v2681_v8 = vor.u32 %v3068_v2, %v2678_v3  ;;  %v3066_v9 = vld [vmem:[%s3692_s3 + $0x50] sm:$0xf0]  ;;  %v2708_v11 = vld [vmem:[%s3692_s3 + $0x98] sm:$0xf] }
 0x184   : > { %1093 = vmatpush.bf16.msra.mxu0 %v2701_v56  ;;  %v2721_v10 = vor.u32 %v3079_v7, %v2720_v6  ;;  %v3076_v12 = vld [vmem:[%s3692_s3 + $0xa0] sm:$0xf0]  ;;  %v3065_v13 = vld [vmem:[%s3692_s3 + $0x4c] sm:$0xf]  ;;  %v2666_v14 = vld [vmem:[%s3692_s3 + $0x54] sm:$0xf0]  ;;  %v2665_v16 = vor.u32 %v3066_v9, %v2664_v5 }
 0x185   : > { %1107 = vmatpush.bf16.msra.mxu1 %v2705_v57  ;;  %v2709_v15 = vor.u32 %v3076_v12, %v2708_v11  ;;  %v2696_v17 = vld [vmem:[%s3692_s3 + $0x80] sm:$0xf]  ;;  %v3073_v18 = vld [vmem:[%s3692_s3 + $0x88] sm:$0xf0]  ;;  %v2669_v19 = vor.u32 %v3065_v13, %v2666_v14  ;;  %v2652_v20 = vld [vmem:[%s3692_s3 + $0x30] sm:$0xf] }
 0x186   : > { %1120 = vmatpush.bf16.msra.mxu2 %v2721_v10  ;;  %v3063_v21 = vld [vmem:[%s3692_s3 + $0x38] sm:$0xf0]  ;;  %v3062_v22 = vld [vmem:[%s3692_s3 + $0x34] sm:$0xf]  ;;  %v2654_v23 = vld [vmem:[%s3692_s3 + $0x3c] sm:$0xf0]  ;;  %v2697_v24 = vor.u32 %v3073_v18, %v2696_v17 }
 0x187   : > { %v2653_v25 = vor.u32 %v3063_v21, %v2652_v20  ;;  %v2684_v26 = vld [vmem:[%s3692_s3 + $0x68] sm:$0xf]  ;;  %v3070_v27 = vld [vmem:[%s3692_s3 + $0x70] sm:$0xf0]  ;;  %v2657_v28 = vor.u32 %v3062_v22, %v2654_v23  ;;  %v2640_v29 = vld [vmem:[%s3692_s3 + $0x18] sm:$0xf] }
 0x188   : > { %1094 = vmatpush.bf16.msra.mxu0 %v2689_v62  ;;  %v3060_v30 = vld [vmem:[%s3692_s3 + $0x20] sm:$0xf0]  ;;  %v3059_v31 = vld [vmem:[%s3692_s3 + $0x1c] sm:$0xf]  ;;  %v2642_v32 = vld [vmem:[%s3692_s3 + $0x24] sm:$0xf0]  ;;  %v2685_v33 = vor.u32 %v3070_v27, %v2684_v26 }
 0x189   : > { %1108 = vmatpush.bf16.msra.mxu1 %v2693_v63  ;;  %v2641_v34 = vor.u32 %v3060_v30, %v2640_v29  ;;  %v2672_v35 = vld [vmem:[%s3692_s3 + $0x50] sm:$0xf]  ;;  %v3067_v36 = vld [vmem:[%s3692_s3 + $0x58] sm:$0xf0]  ;;  %v2645_v37 = vor.u32 %v3059_v31, %v2642_v32  ;;  %v2628_v38 = vld [vmem:[%s3692_s3] sm:$0xf] }
 0x18a   : > { %1121 = vmatpush.bf16.msra.mxu2 %v2709_v15  ;;  %v3057_v39 = vld [vmem:[%s3692_s3 + $0x8] sm:$0xf0]  ;;  %v3056_v40 = vld [vmem:[%s3692_s3 + $0x4] sm:$0xf]  ;;  %v2630_v41 = vld [vmem:[%s3692_s3 + $0xc] sm:$0xf0]  ;;  %v2673_v43 = vor.u32 %v3067_v36, %v2672_v35 }
 0x18b   : > { %v3785_v42 = vld [vmem:[#allocation2] sm:$0xff]  ;;  %v2629_v44 = vor.u32 %v3057_v39, %v2628_v38  ;;  %v3787_v45 = vld [vmem:[#allocation2 + $0x8] sm:$0xff]  ;;  %v2660_v46 = vld [vmem:[%s3692_s3 + $0x38] sm:$0xf]  ;;  %v2633_v48 = vor.u32 %v3056_v40, %v2630_v41  ;;  %vm1148_vm7 = vcmask 261120   ;;  %s3444_s10 = smov 32  }
 0x18c   : > { %1095 = vmatpush.bf16.msra.mxu0 %v2677_v4  ;;  %v3064_v47 = vld [vmem:[%s3692_s3 + $0x40] sm:$0xf0]  ;;  %v923_v49 = vpack.c.bf16 %v3787_v45, %v3785_v42  ;;  %v2648_v51 = vld [vmem:[%s3692_s3 + $0x20] sm:$0xf]  ;;  %v3061_v52 = vld [vmem:[%s3692_s3 + $0x28] sm:$0xf0] }
 0x18d   : > { %1109 = vmatpush.bf16.msra.mxu1 %v2681_v8  ;;  %v2661_v50 = vor.u32 %v3064_v47, %v2660_v46  ;;  %v2649_v53 = vor.u32 %v3061_v52, %v2648_v51  ;;  %v2636_v54 = vld [vmem:[%s3692_s3 + $0x8] sm:$0xf]  ;;  %v3058_v55 = vld [vmem:[%s3692_s3 + $0x10] sm:$0xf0]  ;;  %v956_v57 = vld [vmem:[%s3701_s26] sm:$0x7] }
 0x18e   : > { %1122 = vmatpush.bf16.msra.mxu2 %v2697_v24  ;;  %v2637_v56 = vor.u32 %v3058_v55, %v2636_v54  ;;  %v958_v60 = vperm.slane %v956_v57, 0  ;;  %v959_v61 = vperm.slane %v956_v57, 1  ;;  %v960_v9 = vperm.slane %v956_v57, 2  ;;  %s3442_s3 = smov 96   ;;  %s3443_s26 = smov 64  }
 0x18f   : > { %s4220_s17 = sld [smem:[#allocation17_spill]]  ;;  %vm1169_vm8 = vcmask 130048   ;;  %vm1293_vm9 = vcmask 523520   ;;  %vm1371_vm10 = vcmask 785920   ;;  %vm1449_vm11 = vcmask 1048320   ;;  %p3018_p5 = scmp.ne.s32.totalorder %s3573_s19, 1 }
 0x190   : > { %1096 = vmatpush.bf16.msra.mxu0 %v2665_v16  ;;  %s4225_s30 = sld [smem:[#allocation27_spill]] (!%p3018_p5) }
 0x191   : > { %1110 = vmatpush.bf16.msra.mxu1 %v2669_v19  ;;  %s4226_s25 = sld [smem:[#allocation29_spill]] (!%p3018_p5) }
 0x192   : > { %1123 = vmatpush.bf16.msra.mxu2 %v2685_v33  ;;  %s4228_s19 = sld [smem:[#allocation30_spill]] (!%p3018_p5) }
 0x194   : > { %1097 = vmatpush.bf16.msra.mxu0 %v2653_v25 }
 0x195   : > { %1111 = vmatpush.bf16.msra.mxu1 %v2657_v28  ;;  %v3811_v25 = vld [vmem:[%s4220_s17] sm:$0xff]  ;;  %v3818_v29 = vld [vmem:[%s4220_s17 + $0x8] sm:$0xff] }
 0x196   : > { %1124 = vmatpush.bf16.msra.mxu2 %v2673_v43 }
 0x198   : > { %1098 = vmatpush.bf16.msra.mxu0 %v2641_v34 }
 0x199   : > { %1112 = vmatpush.bf16.msra.mxu1 %v2645_v37 }
 0x19a   : > { %1125 = vmatpush.bf16.msra.mxu2 %v2661_v50 }
 0x19c   : > { %1099 = vmatpush.bf16.msra.mxu0 %v2629_v44 }
 0x19d   : > { %1113 = vmatpush.bf16.msra.mxu1 %v2633_v48 }
 0x19e   : > { %1126 = vmatpush.bf16.msra.mxu2 %v2649_v53 }
 0x19f   : > { %1100 = vmatmul.bf16.vlgmr.msra.gmra.mxu0 %v923_v49 }
 0x1a0   : > { %1114 = vmatmul.bf16.vlgmr.msra.gmra.mxu1 %v923_v49 }
 0x1a2   : > { %1127 = vmatpush.bf16.msra.mxu2 %v2637_v56 }
 0x1a5   : > { %1128 = vmatmul.bf16.vlgmr.msra.gmra.mxu2 %v923_v49 }
 0x21c   : > { %v1101_v58 = vpop.f32.mrf.mxu0 }
 0x21d   : > { %v1115_v59 = vpop.f32.mrf.mxu1  ;;  %v1102_v62 = vadd.f32 %v1101_v58, %v958_v60 }
 0x21e   : > { %v1116_v63 = vadd.f32 %v1115_v59, %v959_v61 }
 0x220   : > { %v1134_v3 = vpack.c.bf16 %v1116_v63, %v1102_v62 }
 0x222   : > { %v1145_v6 = vunpack.c.h.b16 %v1134_v3  ;;  %v1142_v14 = vunpack.c.l.b16 %v1134_v3 }
 0x224   : > { %v1103_v0 = vpop.f32.mrf.mxu0 }
 0x225   : > { %v1104_v1 = vadd.f32 %v1103_v0, %v958_v60  ;;  %v1117_v2 = vpop.f32.mrf.mxu1 }
 0x226   : > { %v1118_v4 = vadd.f32 %v1117_v2, %v959_v61 }
 0x228   : > { %v1136_v5 = vpack.c.bf16 %v1118_v4, %v1104_v1  ;;  %v1129_v10 = vpop.f32.mrf.mxu2 }
 0x229   : > { %v1130_v13 = vadd.f32 %v1129_v10, %v960_v9 }
 0x22a   : > { %v1146_v7 = vunpack.c.h.b16 %v1136_v5  ;;  %v1143_v12 = vunpack.c.l.b16 %v1136_v5 }
 0x22b   : > { %v1135_v16 = vpack.c.bf16 %v1130_v13, %v1130_v13 }
 0x22c   : > { %v1147_v8 = vpack.c.b16 %v1146_v7, %v1145_v6  ;;  %v1144_v15 = vpack.c.b16 %v1143_v12, %v1142_v14 }
 0x22d   : > { %v1195_v19 = vunpack.c.l.b16 %v1135_v16 }
 0x22e   : > { %1220 = vrot.lane.b32.xlu2 %v1147_v8, %s3442_s3  ;;  %v1153_v11 = vsel %vm1148_vm7, %v1147_v8, 0 }
 0x22f   : > { %1162 = vmatpush.bf16.xpose.msra.mxu3 %v1153_v11 }
 0x230   : > { %v1131_v17 = vpop.f32.mrf.mxu2 }
 0x231   : > { %v1132_v18 = vadd.f32 %v1131_v17, %v960_v9 }
 0x233   : > { %v1137_v20 = vpack.c.bf16 %v1132_v18, %v1132_v18 }
 0x235   : > { %v1196_v21 = vunpack.c.l.b16 %v1137_v20 }
 0x236   : > { %1218 = vrot.lane.b32.xlu2 %v1144_v15, %s3442_s3  ;;  %2722 = vmatmul.msk.bf16.vlgmr.msra.gmra.mxu3 %vm1148_vm7, %v1144_v15 }
 0x237   : > { %v3802_v22 = vpack.c.b16 %v1196_v21, %v1195_v19 }
 0x239   : > { %1209 = vmatpush.bf16.msrb.mxu3 %v3802_v22 }
 0x23e   : > { %1296 = vrot.lane.b32.xlu2 %v1144_v15, %s3443_s26 }
 0x246   : > { %1374 = vrot.lane.b32.xlu2 %v1144_v15, %s3444_s10 }
 0x288   : > { %v1221_v23 = vpop.permute.xlu2 %1220 }
 0x289   : > { %v1226_v24 = vsel %vm1148_vm7, %v1221_v23, 0 }
 0x28a   : > { %1235 = vmatpush.bf16.xpose.msra.mxu3 %v1226_v24 }
 0x290   : > { %v1219_v44 = vpop.permute.xlu2 %1218 }
 0x298   : > { %v1297_v48 = vpop.permute.xlu2 %1296 }
 0x2a0   : > { %v1375_v61 = vpop.permute.xlu2 %1374 }
 0x2b9   : > { %v1164_v26 = vpop.f32.mrf.mxu3 }
 0x2ba   : > { %v1165_v27 = vadd.f32 %v1164_v26, %v3811_v25 }
 0x2bc   : > { %v1170_v28 = vsel %vm1169_vm8, %v1165_v27, -inf }
 0x2bd   : > { %1171 = vmax.xlane.f32.xlu0 %v1170_v28 }
 0x2c1   : > { %v1166_v30 = vpop.f32.mrf.mxu3 }
 0x2c2   : > { %v1167_v31 = vadd.f32 %v1166_v30, %v3818_v29 }
 0x2c4   : > { %v1173_v32 = vsel %vm1169_vm8, %v1167_v31, -inf }
 0x2c5   : > { %1174 = vmax.xlane.f32.xlu0 %v1173_v32 }
 0x2d9   : > { %1298 = vrot.lane.b32.xlu0 %v1147_v8, %s3443_s26 }
 0x330   : > { %v1172_v33 = vpop.xlane.xlu0 %1171 }
 0x331   : > { %v1176_v34 = vsub.f32 %v1165_v27, %v1172_v33 }
 0x333   : > { %v1178_v35 = vmul.f32 1.442695, %v1176_v34 }
 0x335   : > { %3240 = vpow2.f32 %v1178_v35 }
 0x338   : > { %v1175_v36 = vpop.xlane.xlu0 %1174 }
 0x339   : > { %v1177_v37 = vsub.f32 %v1167_v31, %v1175_v36 }
 0x33b   : > { %v3241_v38 = vpop.eup %3240  ;;  %v1180_v39 = vmul.f32 1.442695, %v1177_v37 }
 0x33c   : > { %v1182_v40 = vsel %vm1169_vm8, %v3241_v38, 0.0 }
 0x33d   : > { %3242 = vpow2.f32 %v1180_v39  ;;  %1183 = vadd.xlane.f32.xlu1 %v1182_v40 }
 0x343   : > { %v3243_v41 = vpop.eup %3242 }
 0x344   : > { %v1185_v43 = vsel %vm1169_vm8, %v3243_v41, 0.0 }
 0x345   : > { %1186 = vadd.xlane.f32.xlu1 %v1185_v43 }
 0x34b   : > { %v1299_v46 = vpop.permute.xlu0 %1298 }
 0x34c   : > { %v1304_v47 = vsel %vm1148_vm7, %v1299_v46, 0 }
 0x34d   : > { %1313 = vmatpush.bf16.xpose.msrb.mxu2 %v1304_v47 }
 0x354   : > { %2726 = vmatmul.msk.bf16.vlgmr.msrb.gmra.mxu2 %vm1148_vm7, %v1297_v48 }
 0x35e   : > { %1376 = vrot.lane.b32.xlu1 %v1147_v8, %s3444_s10 }
 0x3b0   : > { %v1184_v49 = vpop.xlane.xlu1 %1183 }
 0x3b1   : > { %3244 = vrcp.f32 %v1184_v49 }
 0x3b7   : > { %v3245_v51 = vpop.eup %3244 }
 0x3b8   : > { %v1187_v50 = vpop.xlane.xlu1 %1186  ;;  %v1190_v53 = vmul.f32 %v3245_v51, %v3241_v38 }
 0x3b9   : > { %3246 = vrcp.f32 %v1187_v50 }
 0x3bf   : > { %v3247_v52 = vpop.eup %3246 }
 0x3c0   : > { %v1191_v54 = vmul.f32 %v3247_v52, %v3243_v41 }
 0x3c2   : > { %v1192_v55 = vpack.c.bf16 %v1191_v54, %v1190_v53 }
 0x3c4   : > { %2723 = vmatmul.msk.bf16.vlgmr.msrb.gmra.mxu3 %vm1169_vm8, %v1192_v55 }
 0x3d0   : > { %v1377_v56 = vpop.permute.xlu1 %1376 }
 0x3d1   : > { %v1382_v57 = vsel %vm1148_vm7, %v1377_v56, 0 }
 0x3d2   : > { %1391 = vmatpush.bf16.xpose.msrb.mxu3 %v1382_v57 }
 0x3d4   : > { %2724 = vmatmul.msk.bf16.vlgmr.msra.gmra.mxu3 %vm1148_vm7, %v1219_v44 }
 0x3d7   : > { %v1315_v58 = vpop.f32.mrf.mxu2 }
 0x3d8   : > { %v1316_v59 = vadd.f32 %v1315_v58, %v3811_v25 }
 0x3da   : > { %v1320_v60 = vsel %vm1169_vm8, %v1316_v59, -inf }
 0x3db   : > { %1321 = vmax.xlane.f32.xlu1 %v1320_v60 }
 0x3df   : > { %v1317_v8 = vpop.f32.mrf.mxu2 }
 0x3e0   : > { %v1318_v9 = vadd.f32 %v1317_v8, %v3818_v29 }
 0x3e2   : > { %v1323_v13 = vsel %vm1169_vm8, %v1318_v9, -inf }
 0x3e4   : > { %2728 = vmatmul.msk.bf16.vlgmr.msrb.gmra.mxu3 %vm1148_vm7, %v1375_v61 }
 0x447   : > { %v1211_v62 = vpop.f32.mrf.mxu3 }
 0x448   : > { %1216 = vst.msk [vmem:[#allocation3] sm:$0xff] %vm1148_vm7, %v1211_v62 }
 0x44e   : > { %v1322_v63 = vpop.xlane.xlu1 %1321 }
 0x44f   : > { %v1326_v0 = vsub.f32 %v1316_v59, %v1322_v63  ;;  %v1213_v1 = vpop.f32.mrf.mxu3 }
 0x450   : > { %1217 = vst.msk [vmem:[#allocation3 + $0x8] sm:$0xff] %vm1148_vm7, %v1213_v1 }
 0x451   : > { %v1328_v2 = vmul.f32 1.442695, %v1326_v0 }
 0x453   : > { %3248 = vpow2.f32 %v1328_v2 }
 0x457   : > { %v1237_v3 = vpop.f32.mrf.mxu3 }
 0x458   : > { %v1238_v4 = vadd.f32 %v1237_v3, %v3811_v25 }
 0x459   : > { %v3837_v5 = vpop.eup %3248 }
 0x45a   : > { %v1242_v6 = vsel %vm1169_vm8, %v1238_v4, -inf  ;;  %v1332_v7 = vsel %vm1169_vm8, %v3837_v5, 0.0 }
 0x45b   : > { %1243 = vmax.xlane.f32.xlu2 %v1242_v6  ;;  %1333 = vadd.xlane.f32.xlu1 %v1332_v7 }
 0x45f   : > { %v1239_v10 = vpop.f32.mrf.mxu3 }
 0x460   : > { %v1240_v11 = vadd.f32 %v1239_v10, %v3818_v29 }
 0x462   : > { %v1245_v12 = vsel %vm1169_vm8, %v1240_v11, -inf }
 0x463   : > { %1246 = vmax.xlane.f32.xlu0 %v1245_v12  ;;  %1324 = vmax.xlane.f32.xlu2 %v1323_v13  ;;  %v3087_v13 = vld [vmem:[%s3687_s22 + $0x38] sm:$0xff] }
 0x464   : > { %1523 = vmatpush.bf16.msrb.mxu1 %v3087_v13  ;;  %v3110_v13 = vld [vmem:[%s3660_s1 + $0xac] sm:$0xf0] }
 0x467   : > { %v1393_v14 = vpop.f32.mrf.mxu3 }
 0x468   : > { %v1394_v15 = vadd.f32 %v1393_v14, %v3811_v25  ;;  %v3086_v14 = vld [vmem:[%s3687_s22 + $0x30] sm:$0xff] }
 0x469   : > { %1524 = vmatpush.bf16.msrb.mxu1 %v3086_v14  ;;  %v3108_v14 = vld [vmem:[%s3660_s1 + $0xa4] sm:$0xf] }
 0x46a   : > { %v1398_v16 = vsel %vm1169_vm8, %v1394_v15, -inf }
 0x46b   : > { %1399 = vmax.xlane.f32.xlu0 %v1398_v16  ;;  %v3084_v16 = vld [vmem:[%s3687_s22 + $0x20] sm:$0xff] }
 0x46f   : > { %v1395_v17 = vpop.f32.mrf.mxu3 }
 0x470   : > { %v1396_v18 = vadd.f32 %v1395_v17, %v3818_v29  ;;  %v3083_v17 = vld [vmem:[%s3687_s22 + $0x18] sm:$0xff] }
 0x472   : > { %v1401_v19 = vsel %vm1169_vm8, %v1396_v18, -inf }
 0x473   : > { %1402 = vmax.xlane.f32.xlu2 %v1401_v19  ;;  %v3082_v19 = vld [vmem:[%s3687_s22 + $0x10] sm:$0xff] }
 0x48b   : > { %1265 = vrot.lane.b32.xlu2 %v3802_v22, %s3442_s3 }
 0x4ce   : > { %v1244_v20 = vpop.xlane.xlu2 %1243  ;;  %v1334_v49 = vpop.xlane.xlu1 %1333 }
 0x4cf   : > { %v1248_v21 = vsub.f32 %v1238_v4, %v1244_v20  ;;  %v3081_v20 = vld [vmem:[%s3687_s22 + $0x8] sm:$0xff] }
 0x4d1   : > { %v1250_v23 = vmul.f32 1.442695, %v1248_v21  ;;  %v3080_v21 = vld [vmem:[%s3687_s22] sm:$0xff] }
 0x4d3   : > { %3250 = vpow2.f32 %v1250_v23 }
 0x4d6   : > { %v1325_v24 = vpop.xlane.xlu2 %1324  ;;  %v1247_v26 = vpop.xlane.xlu0 %1246 }
 0x4d7   : > { %v1327_v27 = vsub.f32 %v1318_v9, %v1325_v24  ;;  %v1249_v30 = vsub.f32 %v1240_v11, %v1247_v26 }
 0x4d9   : > { %v3251_v25 = vpop.eup %3250  ;;  %v1330_v28 = vmul.f32 1.442695, %v1327_v27  ;;  %v1252_v29 = vmul.f32 1.442695, %v1249_v30 }
 0x4da   : > { %v1254_v31 = vsel %vm1169_vm8, %v3251_v25, 0.0 }
 0x4db   : > { %3252 = vpow2.f32 %v1330_v28  ;;  %1255 = vadd.xlane.f32.xlu1 %v1254_v31 }
 0x4dc   : > { %3254 = vpow2.f32 %v1252_v29  ;;  %v3234_v29 = vld [vmem:[%s4221_s16] ss:$0 sm:$0xff]  ;;  %s4227_s16 = smov (!%p3018_p5), %s4226_s25 }
 0x4de   : > { %v1400_v32 = vpop.xlane.xlu0 %1399 }
 0x4df   : > { %v1404_v33 = vsub.f32 %v1394_v15, %v1400_v32  ;;  %v3085_v15 = vld [vmem:[%s3687_s22 + $0x28] sm:$0xff] }
 0x4e0   : > { %1525 = vmatpush.bf16.msrb.mxu1 %v3085_v15 }
 0x4e1   : > { %v3253_v34 = vpop.eup %3252  ;;  %v1406_v35 = vmul.f32 1.442695, %v1404_v33 }
 0x4e2   : > { %v1335_v36 = vsel %vm1169_vm8, %v3253_v34, 0.0  ;;  %v3255_v38 = vpop.eup %3254 }
 0x4e3   : > { %3256 = vpow2.f32 %v1406_v35  ;;  %1336 = vadd.xlane.f32.xlu0 %v1335_v36  ;;  %v1257_v43 = vsel %vm1169_vm8, %v3255_v38, 0.0 }
 0x4e4   : > { %1526 = vmatpush.bf16.msrb.mxu1 %v3084_v16  ;;  %v2846_v16 = vld [vmem:[%s3660_s1 + $0xb0] sm:$0xf0] }
 0x4e6   : > { %v1403_v37 = vpop.xlane.xlu2 %1402 }
 0x4e7   : > { %v1405_v39 = vsub.f32 %v1396_v18, %v1403_v37 }
 0x4e8   : > { %1527 = vmatpush.bf16.msrb.mxu1 %v3083_v17  ;;  %v2852_v17 = vld [vmem:[%s3660_s1 + $0xa8] sm:$0xf] }
 0x4e9   : > { %v3257_v40 = vpop.eup %3256  ;;  %v1408_v41 = vmul.f32 1.442695, %v1405_v39 }
 0x4ea   : > { %v1410_v44 = vsel %vm1169_vm8, %v3257_v40, 0.0 }
 0x4eb   : > { %3258 = vpow2.f32 %v1408_v41  ;;  %1258 = vadd.xlane.f32.xlu0 %v1257_v43  ;;  %1411 = vadd.xlane.f32.xlu1 %v1410_v44 }
 0x4ec   : > { %1528 = vmatpush.bf16.msrb.mxu1 %v3082_v19  ;;  %v2849_v19 = vor.u32 %v3108_v14, %v2846_v16  ;;  %v3090_v14 = vld [vmem:[%s3660_s1 + $0xc] sm:$0xf0]  ;;  %v2766_v16 = vld [vmem:[%s3660_s1 + $0x10] sm:$0xf0] }
 0x4ee   : > { %v1266_v46 = vpop.permute.xlu2 %1265 }
 0x4ef   : > { %1278 = vmatpush.bf16.msrb.mxu0 %v1266_v46 }
 0x4f0   : > { %1529 = vmatpush.bf16.msrb.mxu1 %v3081_v20 }
 0x4f1   : > { %v3259_v47 = vpop.eup %3258 }
 0x4f2   : > { %v1413_v48 = vsel %vm1169_vm8, %v3259_v47, 0.0 }
 0x4f3   : > { %1414 = vadd.xlane.f32.xlu0 %v1413_v48 }
 0x4f4   : > { %1530 = vmatpush.bf16.msrb.mxu1 %v3080_v21  ;;  %v3109_v21 = vld [vmem:[%s3660_s1 + $0xac] sm:$0xf] }
 0x504   : > { %1343 = vrot.lane.b32.xlu1 %v3802_v22, %s3443_s26 }
 0x507   : > { %1421 = vrot.lane.b32.xlu0 %v3802_v22, %s3444_s10 }
 0x54e   : > { %v1256_v51 = vpop.xlane.xlu1 %1255 }
 0x54f   : > { %3260 = vrcp.f32 %v1256_v51 }
 0x555   : > { %v3261_v53 = vpop.eup %3260 }
 0x556   : > { %v1337_v50 = vpop.xlane.xlu0 %1336  ;;  %v1262_v55 = vmul.f32 %v3261_v53, %v3251_v25  ;;  %v2876_v53 = vld [vmem:[%s3660_s1 + $0xe0] sm:$0xf] }
 0x55e   : > { %v1259_v52 = vpop.xlane.xlu0 %1258  ;;  %v1412_v59 = vpop.xlane.xlu1 %1411 }
 0x55f   : > { %3262 = vrcp.f32 %v1259_v52 }
 0x560   : > { %3264 = vrcp.f32 %v1337_v50 }
 0x561   : > { %3266 = vrcp.f32 %v1334_v49 }
 0x565   : > { %v3263_v54 = vpop.eup %3262 }
 0x566   : > { %v1263_v56 = vmul.f32 %v3263_v54, %v3255_v38  ;;  %v1415_v58 = vpop.xlane.xlu0 %1414  ;;  %v3265_v22 = vpop.eup %3264  ;;  %v3445_v38 = vmov 128.0   ;;  %v3118_v54 = vld [vmem:[%s3660_s1 + $0xec] sm:$0xf0] }
 0x567   : > { %3268 = vrcp.f32 %v1415_v58  ;;  %v3267_v60 = vpop.eup %3266  ;;  %v1341_v62 = vmul.f32 %v3265_v22, %v3253_v34  ;;  %v2884_v58 = vld [vmem:[%s3660_s1 + $0xe8] sm:$0xf] }
 0x568   : > { %v1264_v57 = vpack.c.bf16 %v1263_v56, %v1262_v55  ;;  %3270 = vrcp.f32 %v1412_v59  ;;  %v1340_v0 = vmul.f32 %v3267_v60, %v3837_v5  ;;  %v3116_v55 = vld [vmem:[%s3660_s1 + $0xe4] sm:$0xf]  ;;  %v2877_v56 = vor.u32 %v3118_v54, %v2876_v53  ;;  %v3119_v59 = vld [vmem:[%s3660_s1 + $0xf4] sm:$0xf0]  ;;  %v3098_v53 = vld [vmem:[%s3660_s1 + $0x4c] sm:$0xf0] }
 0x569   : > { %3272 = vrcp.f32 %v3445_v38  ;;  %v2885_v60 = vor.u32 %v3119_v59, %v2884_v58  ;;  %v3102_v38 = vld [vmem:[%s3660_s1 + $0x6c] sm:$0xf0]  ;;  %v3096_v54 = vld [vmem:[%s3660_s1 + $0x44] sm:$0xf]  ;;  %v3099_v58 = vld [vmem:[%s3660_s1 + $0x54] sm:$0xf0] }
 0x56a   : > { %2725 = vmatmul.msk.bf16.vlgmr.msrb.gmra.mxu0 %vm1169_vm8, %v1264_v57  ;;  %v1342_v3 = vpack.c.bf16 %v1341_v62, %v1340_v0  ;;  %v2878_v57 = vld [vmem:[%s3660_s1 + $0xf0] sm:$0xf0]  ;;  %v2886_v62 = vld [vmem:[%s3660_s1 + $0xf8] sm:$0xf0]  ;;  %v2860_v0 = vld [vmem:[%s3660_s1 + $0xc0] sm:$0xf] }
 0x56b   : > { %v2881_v22 = vor.u32 %v3116_v55, %v2878_v57  ;;  %v2804_v57 = vld [vmem:[%s3660_s1 + $0x48] sm:$0xf] }
 0x56d   : > { %v3269_v61 = vpop.eup %3268  ;;  %1815 = vmatpush.bf16.msra.mxu3 %v2881_v22  ;;  %v2805_v22 = vor.u32 %v3099_v58, %v2804_v57  ;;  %v3150_v57 = vld [vmem:[%s3667_s23 + $0xf0] sm:$0xff]  ;;  %v3127_v58 = vld [vmem:[%s3667_s23 + $0x38] sm:$0xff] }
 0x56e   : > { %v3271_v63 = vpop.eup %3270  ;;  %v1419_v2 = vmul.f32 %v3269_v61, %v3259_v47  ;;  %v3117_v61 = vld [vmem:[%s3660_s1 + $0xec] sm:$0xf] }
 0x56f   : > { %v1418_v4 = vmul.f32 %v3271_v63, %v3257_v40  ;;  %v3273_v39 = vpop.eup %3272  ;;  %v2889_v63 = vor.u32 %v3117_v61, %v2886_v62  ;;  %v2806_v61 = vld [vmem:[%s3660_s1 + $0x58] sm:$0xf0] }
 0x570   : > { %v1546_v40 = vmul.f32 128.0, %v3273_v39  ;;  %vm1550_vm12 = vweird.f32 %v3273_v39 }
 0x571   : > { %v1420_v7 = vpack.c.bf16 %v1419_v2, %v1418_v4  ;;  %v3112_v2 = vld [vmem:[%s3660_s1 + $0xc4] sm:$0xf]  ;;  %1843 = vmatpush.bf16.msra.mxu1 %v2889_v63  ;;  %v2862_v4 = vld [vmem:[%s3660_s1 + $0xd0] sm:$0xf0]  ;;  %v2780_v63 = vld [vmem:[%s3660_s1 + $0x20] sm:$0xf] }
 0x572   : > { %v1547_v41 = vsub.f32 1.0, %v1546_v40 }
 0x574   : > { %v1548_v43 = vmul.f32 %v3273_v39, %v1547_v41  ;;  %v2814_v41 = vld [vmem:[%s3660_s1 + $0x70] sm:$0xf0] }
 0x576   : > { %v1344_v1 = vpop.permute.xlu1 %1343  ;;  %v1549_v44 = vadd.f32 %v3273_v39, %v1548_v43  ;;  %v2820_v43 = vld [vmem:[%s3660_s1 + $0x68] sm:$0xf] }
 0x577   : > { %1356 = vmatpush.bf16.msra.mxu2 %v1344_v1  ;;  %v3114_v1 = vld [vmem:[%s3660_s1 + $0xcc] sm:$0xf0] }
 0x578   : > { %v3886_v46 = vsel %vm1550_vm12, %v3273_v39, %v1549_v44  ;;  %v3100_v39 = vld [vmem:[%s3660_s1 + $0x64] sm:$0xf]  ;;  %v3103_v44 = vld [vmem:[%s3660_s1 + $0x74] sm:$0xf0] }
 0x579   : > { %v1422_v6 = vpop.permute.xlu0 %1421 }
 0x57a   : > { %2727 = vmatmul.msk.bf16.vlgmr.msra.gmra.mxu2 %vm1169_vm8, %v1342_v3  ;;  %1434 = vmatpush.bf16.msra.mxu0 %v1422_v6  ;;  %v2861_v3 = vor.u32 %v3114_v1, %v2860_v0  ;;  %v2868_v6 = vld [vmem:[%s3660_s1 + $0xc8] sm:$0xf]  ;;  %v3094_v0 = vld [vmem:[%s3660_s1 + $0x2c] sm:$0xf0]  ;;  %v3092_v1 = vld [vmem:[%s3660_s1 + $0x24] sm:$0xf] }
 0x57b   : > { %1801 = vmatpush.bf16.msrb.mxu2 %v2877_v56  ;;  %v2798_v56 = vld [vmem:[%s3660_s1 + $0x50] sm:$0xf0] }
 0x57c   : > { %v2801_v59 = vor.u32 %v3096_v54, %v2798_v56  ;;  %v3142_v56 = vld [vmem:[%s3667_s23 + $0xb0] sm:$0xff] }
 0x57d   : > { %2729 = vmatmul.msk.bf16.vlgmr.msra.gmra.mxu0 %vm1169_vm8, %v1420_v7  ;;  %v3115_v7 = vld [vmem:[%s3660_s1 + $0xd4] sm:$0xf0] }
 0x57e   : > { %1829 = vmatpush.bf16.msrb.mxu0 %v2885_v60  ;;  %v3097_v60 = vld [vmem:[%s3660_s1 + $0x4c] sm:$0xf] }
 0x57f   : > { %1802 = vmatpush.bf16.msrb.mxu2 %v2861_v3  ;;  %v2809_v62 = vor.u32 %v3097_v60, %v2806_v61  ;;  %v2782_v3 = vld [vmem:[%s3660_s1 + $0x30] sm:$0xf0]  ;;  %v3149_v60 = vld [vmem:[%s3667_s23 + $0xe8] sm:$0xff] }
 0x580   : > { %v3126_v61 = vld [vmem:[%s3667_s23 + $0x30] sm:$0xff] }
 0x5e7   : > { %v1280_v8 = vpop.f32.mrf.mxu0 }
 0x5ef   : > { %v1282_v9 = vpop.f32.mrf.mxu0 }
 0x5fa   : > { %v1436_v10 = vpop.f32.mrf.mxu0 }
 0x5fb   : > { %1443 = vrot.lane.b32.xlu1 %v1436_v10, %s3442_s3  ;;  %v3113_v10 = vld [vmem:[%s3660_s1 + $0xcc] sm:$0xf] }
 0x5fd   : > { %v1358_v5 = vpop.f32.mrf.mxu2 }
 0x5fe   : > { %1365 = vrot.lane.b32.xlu2 %v1358_v5, %s3443_s26  ;;  %v2870_v5 = vld [vmem:[%s3660_s1 + $0xd8] sm:$0xf0] }
 0x602   : > { %v1438_v12 = vpop.f32.mrf.mxu0 }
 0x605   : > { %v1360_v11 = vpop.f32.mrf.mxu2 }
 0x606   : > { %1367 = vrot.lane.b32.xlu0 %v1360_v11, %s3443_s26  ;;  %1287 = vrot.lane.b32.xlu2 %v1280_v8, %s3444_s10  ;;  %v2865_v8 = vor.u32 %v3112_v2, %v2862_v4  ;;  %v2873_v11 = vor.u32 %v3113_v10, %v2870_v5  ;;  %v2781_v2 = vor.u32 %v3094_v0, %v2780_v63  ;;  %v2788_v4 = vld [vmem:[%s3660_s1 + $0x28] sm:$0xf]  ;;  %v3093_v10 = vld [vmem:[%s3660_s1 + $0x2c] sm:$0xf] }
 0x607   : > { %v2790_v5 = vld [vmem:[%s3660_s1 + $0x38] sm:$0xf0]  ;;  %v3140_v63 = vld [vmem:[%s3667_s23 + $0xa0] sm:$0xff] }
 0x608   : > { %1816 = vmatpush.bf16.msra.mxu3 %v2865_v8  ;;  %1844 = vmatpush.bf16.msra.mxu1 %v2873_v11  ;;  %v2785_v8 = vor.u32 %v3092_v1, %v2782_v3  ;;  %v2764_v11 = vld [vmem:[%s3660_s1] sm:$0xf]  ;;  %v3125_v1 = vld [vmem:[%s3667_s23 + $0x28] sm:$0xff]  ;;  %v3139_v3 = vld [vmem:[%s3667_s23 + $0x98] sm:$0xff] }
 0x609   : > { %v3148_v0 = vld [vmem:[%s3667_s23 + $0xe0] sm:$0xff] }
 0x60c   : > { %1817 = vmatpush.bf16.msra.mxu3 %v2849_v19  ;;  %v2772_v19 = vld [vmem:[%s3660_s1 + $0x8] sm:$0xf] }
 0x60e   : > { %1289 = vrot.lane.b32.xlu2 %v1282_v9, %s3444_s10  ;;  %v2869_v9 = vor.u32 %v3115_v7, %v2868_v6  ;;  %v3095_v6 = vld [vmem:[%s3660_s1 + $0x34] sm:$0xf0] }
 0x610   : > { %1830 = vmatpush.bf16.msrb.mxu0 %v2869_v9  ;;  %v2789_v9 = vor.u32 %v3095_v6, %v2788_v4  ;;  %v3147_v4 = vld [vmem:[%s3667_s23 + $0xd8] sm:$0xff]  ;;  %v3124_v6 = vld [vmem:[%s3667_s23 + $0x20] sm:$0xff] }
 0x616   : > { %1445 = vrot.lane.b32.xlu2 %v1438_v12, %s3442_s3  ;;  %v2844_v12 = vld [vmem:[%s3660_s1 + $0xa0] sm:$0xf] }
 0x617   : > { %v2845_v15 = vor.u32 %v3110_v13, %v2844_v12  ;;  %v2793_v13 = vor.u32 %v3093_v10, %v2790_v5  ;;  %v3123_v10 = vld [vmem:[%s3667_s23 + $0x18] sm:$0xff] }
 0x618   : > { %v3131_v5 = vld [vmem:[%s3667_s23 + $0x58] sm:$0xff] }
 0x619   : > { %1803 = vmatpush.bf16.msrb.mxu2 %v2845_v15  ;;  %v3088_v15 = vld [vmem:[%s3660_s1 + $0x4] sm:$0xf] }
 0x658   : > { %v1366_v18 = vpop.permute.xlu2 %1365 }
 0x660   : > { %v1288_v23 = vpop.permute.xlu2 %1287 }
 0x661   : > { %1294 = vst.msk [vmem:[#allocation3] sm:$0xff] %vm1293_vm9, %v1288_v23  ;;  %v2854_v23 = vld [vmem:[%s3660_s1 + $0xb8] sm:$0xf0] }
 0x662   : > { %1372 = vst.msk [vmem:[#allocation3] sm:$0xff] %vm1371_vm10, %v1366_v18  ;;  %v3111_v18 = vld [vmem:[%s3660_s1 + $0xb4] sm:$0xf0] }
 0x663   : > { %v2853_v20 = vor.u32 %v3111_v18, %v2852_v17  ;;  %v2765_v17 = vor.u32 %v3090_v14, %v2764_v11  ;;  %v2769_v18 = vor.u32 %v3088_v15, %v2766_v16  ;;  %v3137_v11 = vld [vmem:[%s3667_s23 + $0x88] sm:$0xff]  ;;  %v3122_v14 = vld [vmem:[%s3667_s23 + $0x10] sm:$0xff]  ;;  %v3136_v16 = vld [vmem:[%s3667_s23 + $0x80] sm:$0xff] }
 0x664   : > { %v3130_v15 = vld [vmem:[%s3667_s23 + $0x50] sm:$0xff] }
 0x665   : > { %1831 = vmatpush.bf16.msrb.mxu0 %v2853_v20  ;;  %v3091_v20 = vld [vmem:[%s3660_s1 + $0x14] sm:$0xf0] }
 0x668   : > { %v1290_v24 = vpop.permute.xlu2 %1289 }
 0x669   : > { %1295 = vst.msk [vmem:[#allocation3 + $0x8] sm:$0xff] %vm1293_vm9, %v1290_v24  ;;  %v2857_v24 = vor.u32 %v3109_v21, %v2854_v23  ;;  %v3089_v21 = vld [vmem:[%s3660_s1 + $0xc] sm:$0xf] }
 0x66b   : > { %1845 = vmatpush.bf16.msra.mxu1 %v2857_v24  ;;  %v2773_v24 = vor.u32 %v3091_v20, %v2772_v19  ;;  %v3121_v20 = vld [vmem:[%s3667_s23 + $0x8] sm:$0xff] }
 0x66d   : > { %v1444_v26 = vpop.permute.xlu1 %1443 }
 0x66e   : > { %1450 = vst.msk [vmem:[#allocation3] sm:$0xff] %vm1449_vm11, %v1444_v26  ;;  %v2828_v26 = vld [vmem:[%s3660_s1 + $0x80] sm:$0xf] }
 0x670   : > { %v1446_v25 = vpop.permute.xlu2 %1445 }
 0x675   : > { %v1452_v28 = vld [vmem:[#allocation3] sm:$0xff] }
 0x678   : > { %v1368_v27 = vpop.permute.xlu0 %1367 }
 0x679   : > { %1373 = vst.msk [vmem:[#allocation3 + $0x8] sm:$0xff] %vm1371_vm10, %v1368_v27  ;;  %v3106_v27 = vld [vmem:[%s3660_s1 + $0x8c] sm:$0xf0] }
 0x67a   : > { %1451 = vst.msk [vmem:[#allocation3 + $0x8] sm:$0xff] %vm1449_vm11, %v1446_v25  ;;  %v3104_v25 = vld [vmem:[%s3660_s1 + $0x84] sm:$0xf] }
 0x681   : > { %v1453_v30 = vld [vmem:[#allocation3 + $0x8] sm:$0xff] }
 0x682   : > { %v1454_v31 = vpack.c.bf16 %v1453_v30, %v1452_v28  ;;  %v2829_v28 = vor.u32 %v3106_v27, %v2828_v26  ;;  %v2830_v30 = vld [vmem:[%s3660_s1 + $0x90] sm:$0xf0]  ;;  %v2774_v26 = vld [vmem:[%s3660_s1 + $0x18] sm:$0xf0] }
 0x683   : > { %v2777_v27 = vor.u32 %v3089_v21, %v2774_v26  ;;  %v3129_v21 = vld [vmem:[%s3667_s23 + $0x48] sm:$0xff] }
 0x684   : > { %1531 = vmatmul.bf16.vlgmr.msrb.gmra.mxu1 %v1454_v31  ;;  %v2836_v31 = vld [vmem:[%s3660_s1 + $0x88] sm:$0xf]  ;;  %1804 = vmatpush.bf16.msrb.mxu2 %v2829_v28 }
 0x701   : > { %v1532_v32 = vpop.f32.mrf.mxu1 }
 0x702   : > { %v1533_v33 = vadd.f32 %v3234_v29, %v1532_v32  ;;  %v2833_v32 = vor.u32 %v3104_v25, %v2830_v30 }
 0x704   : > { %v1537_v34 = vadd.f32 %v1533_v33, %v3785_v42  ;;  %1818 = vmatpush.bf16.msra.mxu3 %v2833_v32 }
 0x706   : > { %1541 = vadd.xlane.f32.xlu0 %v1537_v34 }
 0x709   : > { %v1534_v35 = vpop.f32.mrf.mxu1 }
 0x70a   : > { %v1535_v36 = vadd.f32 %v3234_v29, %v1534_v35  ;;  %v3107_v29 = vld [vmem:[%s3660_s1 + $0x94] sm:$0xf0]  ;;  %v2838_v35 = vld [vmem:[%s3660_s1 + $0x98] sm:$0xf0] }
 0x70b   : > { %v2837_v33 = vor.u32 %v3107_v29, %v2836_v31 }
 0x70c   : > { %v1538_v37 = vadd.f32 %v1535_v36, %v3787_v45 }
 0x70d   : > { %1832 = vmatpush.bf16.msrb.mxu0 %v2837_v33 }
 0x70e   : > { %1543 = vadd.xlane.f32.xlu1 %v1538_v37 }
 0x779   : > { %v1542_v42 = vpop.xlane.xlu0 %1541 }
 0x77a   : > { %v1552_v45 = vmul.f32 %v3886_v46, %v1542_v42  ;;  %v2817_v42 = vor.u32 %v3100_v39, %v2814_v41 }
 0x77c   : > { %v3889_v47 = vsub.f32 %v1537_v34, %v1552_v45  ;;  %v3105_v34 = vld [vmem:[%s3660_s1 + $0x8c] sm:$0xf]  ;;  %v2821_v45 = vor.u32 %v3103_v44, %v2820_v43  ;;  %1819 = vmatpush.bf16.msra.mxu3 %v2817_v42  ;;  %v3235_v44 = vld [vmem:[%s4222_s14] ss:$0 sm:$0xff] }
 0x77d   : > { %v2841_v36 = vor.u32 %v3105_v34, %v2838_v35 }
 0x77e   : > { %v1556_v48 = vmul.f32 %v3889_v47, %v3889_v47  ;;  %1833 = vmatpush.bf16.msrb.mxu0 %v2821_v45 }
 0x77f   : > { %1846 = vmatpush.bf16.msra.mxu1 %v2841_v36 }
 0x780   : > { %1558 = vadd.xlane.f32.xlu2 %v1556_v48  ;;  %v3101_v48 = vld [vmem:[%s3660_s1 + $0x6c] sm:$0xf]  ;;  %1820 = vmatpush.bf16.msra.mxu3 %v2801_v59  ;;  %v3135_v59 = vld [vmem:[%s3667_s23 + $0x78] sm:$0xff] }
 0x781   : > { %v1544_v49 = vpop.xlane.xlu1 %1543 }
 0x782   : > { %v1553_v50 = vmul.f32 %v3886_v46, %v1544_v49  ;;  %v2822_v49 = vld [vmem:[%s3660_s1 + $0x78] sm:$0xf0]  ;;  %1834 = vmatpush.bf16.msrb.mxu0 %v2805_v22  ;;  %v3141_v22 = vld [vmem:[%s3667_s23 + $0xa8] sm:$0xff] }
 0x784   : > { %v3894_v51 = vsub.f32 %v1538_v37, %v1553_v50  ;;  %v2812_v37 = vld [vmem:[%s3660_s1 + $0x60] sm:$0xf]  ;;  %v2825_v50 = vor.u32 %v3101_v48, %v2822_v49  ;;  %1821 = vmatpush.bf16.msra.mxu3 %v2785_v8  ;;  %v3138_v8 = vld [vmem:[%s3667_s23 + $0x90] sm:$0xff] }
 0x785   : > { %v2813_v40 = vor.u32 %v3102_v38, %v2812_v37 }
 0x786   : > { %v1557_v52 = vmul.f32 %v3894_v51, %v3894_v51  ;;  %1847 = vmatpush.bf16.msra.mxu1 %v2825_v50  ;;  %1835 = vmatpush.bf16.msrb.mxu0 %v2789_v9  ;;  %v3146_v9 = vld [vmem:[%s3667_s23 + $0xd0] sm:$0xff] }
 0x787   : > { %1805 = vmatpush.bf16.msrb.mxu2 %v2813_v40 }
 0x788   : > { %1560 = vadd.xlane.f32.xlu0 %v1557_v52  ;;  %v2796_v52 = vld [vmem:[%s3660_s1 + $0x40] sm:$0xf]  ;;  %1822 = vmatpush.bf16.msra.mxu3 %v2769_v18 }
 0x789   : > { %v2797_v55 = vor.u32 %v3098_v53, %v2796_v52 }
 0x78a   : > { %1848 = vmatpush.bf16.msra.mxu1 %v2809_v62  ;;  %1836 = vmatpush.bf16.msrb.mxu0 %v2773_v24  ;;  %v3134_v62 = vld [vmem:[%s3667_s23 + $0x70] sm:$0xff] }
 0x78b   : > { %1806 = vmatpush.bf16.msrb.mxu2 %v2797_v55  ;;  %v3151_v55 = vld [vmem:[%s3667_s23 + $0xf8] sm:$0xff] }
 0x78c   : > { %2207 = vmatpush.bf16.msrb.mxu3 %v3135_v59 }
 0x78e   : > { %1849 = vmatpush.bf16.msra.mxu1 %v2793_v13  ;;  %v4007_v13 = vld [vmem:[%s3715_s15] sm:$0xf] }
 0x78f   : > { %1807 = vmatpush.bf16.msrb.mxu2 %v2781_v2  ;;  %v3133_v2 = vld [vmem:[%s3667_s23 + $0x68] sm:$0xff]  ;;  %v1635_v18 = vperm.slane %v4007_v13, 2  ;;  %v1636_v19 = vperm.slane %v4007_v13, 3 }
 0x790   : > { %2208 = vmatpush.bf16.msrb.mxu3 %v3134_v62 }
 0x792   : > { %1850 = vmatpush.bf16.msra.mxu1 %v2777_v27 }
 0x793   : > { %1808 = vmatpush.bf16.msrb.mxu2 %v2765_v17  ;;  %v3144_v17 = vld [vmem:[%s3667_s23 + $0xc0] sm:$0xff] }
 0x794   : > { %2209 = vmatpush.bf16.msrb.mxu3 %v3133_v2 }
 0x796   : > { %2235 = vmatpush.bf16.msrb.mxu1 %v3151_v55 }
 0x797   : > { %2193 = vmatpush.bf16.msra.mxu2 %v3127_v58 }
 0x79a   : > { %2236 = vmatpush.bf16.msrb.mxu1 %v3150_v57 }
 0x79b   : > { %2194 = vmatpush.bf16.msra.mxu2 %v3126_v61 }
 0x79e   : > { %2237 = vmatpush.bf16.msrb.mxu1 %v3149_v60 }
 0x79f   : > { %2195 = vmatpush.bf16.msra.mxu2 %v3125_v1 }
 0x7a2   : > { %2238 = vmatpush.bf16.msrb.mxu1 %v3148_v0 }
 0x7a3   : > { %2196 = vmatpush.bf16.msra.mxu2 %v3124_v6 }
 0x7a6   : > { %2239 = vmatpush.bf16.msrb.mxu1 %v3147_v4 }
 0x7a7   : > { %2197 = vmatpush.bf16.msra.mxu2 %v3123_v10 }
 0x7aa   : > { %2240 = vmatpush.bf16.msrb.mxu1 %v3146_v9 }
 0x7ab   : > { %2198 = vmatpush.bf16.msra.mxu2 %v3122_v14 }
 0x7af   : > { %2199 = vmatpush.bf16.msra.mxu2 %v3121_v20 }
 0x7f3   : > { %v1559_v7 = vpop.xlane.xlu2 %1558 }
 0x7f4   : > { %v1562_v12 = vmul.f32 %v1559_v7, %v3886_v46  ;;  %v3132_v7 = vld [vmem:[%s3667_s23 + $0x60] sm:$0xff] }
 0x7f5   : > { %2210 = vmatpush.bf16.msrb.mxu3 %v3132_v7 }
 0x7f6   : > { %v1564_v23 = vadd.f32 1e-12, %v1562_v12  ;;  %v3145_v12 = vld [vmem:[%s3667_s23 + $0xc8] sm:$0xff] }
 0x7f7   : > { %2241 = vmatpush.bf16.msrb.mxu1 %v3145_v12 }
 0x7f8   : > { %3274 = vrsqrt.f32 %v1564_v23  ;;  %vm1572_vm14 = vweird.f32 %v1564_v23 }
 0x7f9   : > { %2211 = vmatpush.bf16.msrb.mxu3 %v3131_v5 }
 0x7fb   : > { %v1561_v25 = vpop.xlane.xlu0 %1560  ;;  %2242 = vmatpush.bf16.msrb.mxu1 %v3144_v17 }
 0x7fc   : > { %v1563_v28 = vmul.f32 %v1561_v25, %v3886_v46  ;;  %v1633_v25 = vperm.slane %v4007_v13, 0 }
 0x7fd   : > { %2212 = vmatpush.bf16.msrb.mxu3 %v3130_v15 }
 0x7fe   : > { %v3275_v30 = vpop.eup %3274  ;;  %v1565_v31 = vadd.f32 1e-12, %v1563_v28  ;;  %v1634_v28 = vperm.slane %v4007_v13, 1 }
 0x7ff   : > { %v1567_v29 = vmul.f32 %v3275_v30, %v1564_v23  ;;  %vm1573_vm13 = vweird.f32 %v3275_v30 }
 0x800   : > { %3276 = vrsqrt.f32 %v1565_v31  ;;  %vm1574_vm15 = vmor %vm1572_vm14, %vm1573_vm13  ;;  %vm1582_vm1 = vweird.f32 %v1565_v31 }
 0x801   : > { %v1568_v32 = vmul.f32 %v3275_v30, %v1567_v29  ;;  %2213 = vmatpush.bf16.msrb.mxu3 %v3129_v21  ;;  %v3120_v29 = vld [vmem:[%s3667_s23] sm:$0xff] }
 0x802   : > { %2200 = vmatpush.bf16.msra.mxu2 %v3120_v29 }
 0x803   : > { %v1569_v33 = vmul.f32 0.5, %v1568_v32  ;;  %v3128_v32 = vld [vmem:[%s3667_s23 + $0x40] sm:$0xff] }
 0x805   : > { %v1570_v34 = vsub.f32 1.5, %v1569_v33  ;;  %2214 = vmatpush.bf16.msrb.mxu3 %v3128_v32 }
 0x806   : > { %v3277_v35 = vpop.eup %3276 }
 0x807   : > { %v1571_v36 = vmul.f32 %v3275_v30, %v1570_v34  ;;  %v1577_v37 = vmul.f32 %v3277_v35, %v1565_v31  ;;  %vm1583_vm0 = vweird.f32 %v3277_v35 }
 0x808   : > { %vm1584_vm2 = vmor %vm1582_vm1, %vm1583_vm0 }
 0x809   : > { %v1578_v38 = vmul.f32 %v3277_v35, %v1577_v37  ;;  %v1575_v39 = vsel %vm1574_vm15, %v3275_v30, %v1571_v36 }
 0x80a   : > { %v1586_v43 = vmul.f32 %v1575_v39, %v3889_v47  ;;  %v3236_v47 = vld [vmem:[%s839_s6] ss:$0 sm:$0xff] }
 0x80b   : > { %v1579_v40 = vmul.f32 0.5, %v1578_v38 }
 0x80c   : > { %v1591_v49 = vmul.f32 %v3235_v44, %v1586_v43 }
 0x80d   : > { %v1580_v41 = vsub.f32 1.5, %v1579_v40 }
 0x80e   : > { %v3976_v52 = vadd.f32 %v3236_v47, %v1591_v49 }
 0x80f   : > { %v1581_v42 = vmul.f32 %v3277_v35, %v1580_v41 }
 0x811   : > { %v1585_v45 = vsel %vm1584_vm2, %v3277_v35, %v1581_v42 }
 0x812   : > { %v1587_v48 = vmul.f32 %v1585_v45, %v3894_v51  ;;  %v3143_v51 = vld [vmem:[%s3667_s23 + $0xb8] sm:$0xff] }
 0x813   : > { %2221 = vmatpush.bf16.msra.mxu0 %v3143_v51 }
 0x814   : > { %v1592_v50 = vmul.f32 %v3235_v44, %v1587_v48 }
 0x816   : > { %v3978_v53 = vadd.f32 %v3236_v47, %v1592_v50 }
 0x817   : > { %2222 = vmatpush.bf16.msra.mxu0 %v3142_v56 }
 0x818   : > { %v1598_v54 = vpack.c.bf16 %v3978_v53, %v3976_v52 }
 0x81a   : > { %1809 = vmatmul.bf16.vlgmr.msrb.gmra.mxu2 %v1598_v54  ;;  %1823 = vmatmul.bf16.vlgmr.msra.gmra.mxu3 %v1598_v54 }
 0x81b   : > { %1837 = vmatmul.bf16.vlgmr.msrb.gmra.mxu0 %v1598_v54  ;;  %1851 = vmatmul.bf16.vlgmr.msra.gmra.mxu1 %v1598_v54 }
 0x81c   : > { %2223 = vmatpush.bf16.msra.mxu0 %v3141_v22 }
 0x820   : > { %2224 = vmatpush.bf16.msra.mxu0 %v3140_v63 }
 0x824   : > { %2225 = vmatpush.bf16.msra.mxu0 %v3139_v3 }
 0x828   : > { %2226 = vmatpush.bf16.msra.mxu0 %v3138_v8 }
 0x82c   : > { %2227 = vmatpush.bf16.msra.mxu0 %v3137_v11 }
 0x830   : > { %2228 = vmatpush.bf16.msra.mxu0 %v3136_v16 }
 0x898   : > { %v1838_v23 = vpop.f32.mrf.mxu0  ;;  %v1852_v24 = vpop.f32.mrf.mxu1 }
 0x899   : > { %v4017_v26 = vadd.f32 %v1838_v23, %v1635_v18  ;;  %v4019_v27 = vadd.f32 %v1852_v24, %v1636_v19 }
 0x89b   : > { %v1867_v30 = vmul.f32 0.044715, %v4017_v26  ;;  %v1868_v31 = vmul.f32 0.044715, %v4019_v27  ;;  %v1859_v29 = vmul.f32 0.5, %v4017_v26 }
 0x89d   : > { %v1875_v33 = vmul.f32 %v1867_v30, %v4017_v26  ;;  %v1876_v34 = vmul.f32 %v1868_v31, %v4019_v27  ;;  %v1810_v35 = vpop.f32.mrf.mxu2  ;;  %v1824_v36 = vpop.f32.mrf.mxu3 }
 0x89e   : > { %v4029_v37 = vadd.f32 %v1810_v35, %v1633_v25  ;;  %v4031_v38 = vadd.f32 %v1824_v36, %v1634_v28  ;;  %v1860_v35 = vmul.f32 0.5, %v4019_v27 }
 0x89f   : > { %v1883_v39 = vmul.f32 %v1875_v33, %v4017_v26  ;;  %v1884_v40 = vmul.f32 %v1876_v34, %v4019_v27 }
 0x8a0   : > { %v1865_v41 = vmul.f32 0.044715, %v4029_v37  ;;  %v1866_v43 = vmul.f32 0.044715, %v4031_v38  ;;  %v1840_v44 = vpop.f32.mrf.mxu0  ;;  %v1854_v42 = vpop.f32.mrf.mxu1 }
 0x8a1   : > { %v1891_v45 = vadd.f32 %v1883_v39, %v4017_v26  ;;  %v1841_v48 = vadd.f32 %v1840_v44, %v1635_v18  ;;  %v1855_v49 = vadd.f32 %v1854_v42, %v1636_v19  ;;  %v1892_v47 = vadd.f32 %v1884_v40, %v4019_v27 }
 0x8a2   : > { %v1873_v50 = vmul.f32 %v1865_v41, %v4029_v37  ;;  %v1874_v54 = vmul.f32 %v1866_v43, %v4031_v38  ;;  %v1858_v27 = vmul.f32 0.5, %v4031_v38 }
 0x8a3   : > { %v1871_v51 = vmul.f32 0.044715, %v1841_v48  ;;  %v1872_v57 = vmul.f32 0.044715, %v1855_v49  ;;  %v1899_v58 = vmul.f32 0.7978846, %v1891_v45 }
 0x8a4   : > { %v1881_v55 = vmul.f32 %v1873_v50, %v4029_v37  ;;  %v1882_v56 = vmul.f32 %v1874_v54, %v4031_v38  ;;  %v1900_v61 = vmul.f32 0.7978846, %v1892_v47  ;;  %v1863_v32 = vmul.f32 0.5, %v1841_v48 }
 0x8a5   : > { %v1879_v59 = vmul.f32 %v1871_v51, %v1841_v48  ;;  %v1812_v22 = vpop.f32.mrf.mxu2  ;;  %v1826_v60 = vpop.f32.mrf.mxu3  ;;  %v1880_v63 = vmul.f32 %v1872_v57, %v1855_v49  ;;  %3278 = vtanh.f32 %v1899_v58  ;;  %v1864_v36 = vmul.f32 0.5, %v1855_v49 }
 0x8a6   : > { %v1889_v62 = vadd.f32 %v1881_v55, %v4029_v37  ;;  %v1813_v0 = vadd.f32 %v1812_v22, %v1633_v25  ;;  %v1890_v1 = vadd.f32 %v1882_v56, %v4031_v38  ;;  %v1827_v3 = vadd.f32 %v1826_v60, %v1634_v28 }
 0x8a7   : > { %v1887_v2 = vmul.f32 %v1879_v59, %v1841_v48  ;;  %v1888_v6 = vmul.f32 %v1880_v63, %v1855_v49  ;;  %3280 = vtanh.f32 %v1900_v61  ;;  %v1857_v55 = vmul.f32 0.5, %v4029_v37  ;;  %v3237_v37 = vld [vmem:[%s846_s0] ss:$0 sm:$0xff] }
 0x8a8   : > { %v1897_v4 = vmul.f32 0.7978846, %v1889_v62  ;;  %v1869_v7 = vmul.f32 0.044715, %v1813_v0  ;;  %v1870_v9 = vmul.f32 0.044715, %v1827_v3 }
 0x8a9   : > { %v1895_v8 = vadd.f32 %v1887_v2, %v1841_v48  ;;  %v1896_v10 = vadd.f32 %v1888_v6, %v1855_v49  ;;  %v1898_v11 = vmul.f32 0.7978846, %v1890_v1  ;;  %v1861_v26 = vmul.f32 0.5, %v1813_v0 }
 0x8aa   : > { %v1877_v5 = vmul.f32 %v1869_v7, %v1813_v0  ;;  %v1878_v13 = vmul.f32 %v1870_v9, %v1827_v3  ;;  %3282 = vtanh.f32 %v1897_v4  ;;  %v1862_v49 = vmul.f32 0.5, %v1827_v3 }
 0x8ab   : > { %v1903_v12 = vmul.f32 0.7978846, %v1895_v8  ;;  %v1904_v14 = vmul.f32 0.7978846, %v1896_v10  ;;  %v3279_v18 = vpop.eup %3278 }
 0x8ac   : > { %v1885_v15 = vmul.f32 %v1877_v5, %v1813_v0  ;;  %v1886_v16 = vmul.f32 %v1878_v13, %v1827_v3  ;;  %v1915_v25 = vadd.f32 1.0, %v3279_v18 }
 0x8ad   : > { %3284 = vtanh.f32 %v1903_v12  ;;  %v3281_v20 = vpop.eup %3280 }
 0x8ae   : > { %v1893_v17 = vadd.f32 %v1885_v15, %v1813_v0  ;;  %3286 = vtanh.f32 %v1904_v14  ;;  %v1894_v19 = vadd.f32 %v1886_v16, %v1827_v3  ;;  %v1916_v30 = vadd.f32 1.0, %v3281_v20 }
 0x8af   : > { %3288 = vtanh.f32 %v1898_v11  ;;  %v1923_v40 = vmul.f32 %v1915_v25, %v1859_v29 }
 0x8b0   : > { %v1901_v21 = vmul.f32 0.7978846, %v1893_v17  ;;  %v1902_v23 = vmul.f32 0.7978846, %v1894_v19  ;;  %v3283_v24 = vpop.eup %3282  ;;  %v1924_v43 = vmul.f32 %v1916_v30, %v1860_v35 }
 0x8b1   : > { %v1913_v42 = vadd.f32 1.0, %v3283_v24 }
 0x8b2   : > { %3290 = vtanh.f32 %v1901_v21 }
 0x8b3   : > { %v3285_v28 = vpop.eup %3284  ;;  %3292 = vtanh.f32 %v1902_v23  ;;  %v1921_v57 = vmul.f32 %v1913_v42, %v1857_v55 }
 0x8b4   : > { %v3287_v31 = vpop.eup %3286  ;;  %v1919_v33 = vadd.f32 1.0, %v3285_v28 }
 0x8b5   : > { %v3289_v34 = vpop.eup %3288  ;;  %v1920_v39 = vadd.f32 1.0, %v3287_v31 }
 0x8b6   : > { %v1927_v41 = vmul.f32 %v1919_v33, %v1863_v32  ;;  %v1914_v50 = vadd.f32 1.0, %v3289_v34 }
 0x8b7   : > { %v1928_v44 = vmul.f32 %v1920_v39, %v1864_v36 }
 0x8b8   : > { %v3291_v45 = vpop.eup %3290  ;;  %v1931_v47 = vpack.c.bf16 %v1927_v41, %v1923_v40  ;;  %v1922_v59 = vmul.f32 %v1914_v50, %v1858_v27  ;;  %v3238_v40 = vld [vmem:[%s849_s5] ss:$0 sm:$0xff] }
 0x8b9   : > { %v3293_v54 = vpop.eup %3292  ;;  %v1932_v51 = vpack.c.bf16 %v1928_v44, %v1924_v43  ;;  %v1917_v48 = vadd.f32 1.0, %v3291_v45  ;;  %v3239_v43 = vld [vmem:[%s852_s12] ss:$0 sm:$0xff] }
 0x8ba   : > { %2229 = vmatmul.bf16.vlgmr.msra.gmra.mxu0 %v1931_v47  ;;  %v1918_v56 = vadd.f32 1.0, %v3293_v54 }
 0x8bb   : > { %2243 = vmatmul.bf16.vlgmr.msrb.gmra.mxu1 %v1932_v51  ;;  %v1925_v58 = vmul.f32 %v1917_v48, %v1861_v26 }
 0x8bc   : > { %v1926_v22 = vmul.f32 %v1918_v56, %v1862_v49 }
 0x8bd   : > { %v1929_v60 = vpack.c.bf16 %v1925_v58, %v1921_v57 }
 0x8be   : > { %v1930_v61 = vpack.c.bf16 %v1926_v22, %v1922_v59 }
 0x8bf   : > { %2201 = vmatmul.bf16.vlgmr.msra.gmra.mxu2 %v1929_v60 }
 0x8c0   : > { %2215 = vmatmul.bf16.vlgmr.msrb.gmra.mxu3 %v1930_v61 }
 0x937   : > { %v2230_v38 = vpop.f32.mrf.mxu0 }
 0x938   : > { %v2244_v2 = vpop.f32.mrf.mxu1 }
 0x93f   : > { %v2232_v5 = vpop.f32.mrf.mxu0 }
 0x940   : > { %v2246_v12 = vpop.f32.mrf.mxu1 }
 0x942   : > { %v2202_v62 = vpop.f32.mrf.mxu2 }
 0x943   : > { %v2203_v63 = vadd.f32 %v3237_v37, %v2202_v62  ;;  %v2216_v0 = vpop.f32.mrf.mxu3 }
 0x945   : > { %v2217_v1 = vadd.f32 %v2216_v0, %v2203_v63 }
 0x947   : > { %v2231_v3 = vadd.f32 %v2230_v38, %v2217_v1 }
 0x949   : > { %v2245_v4 = vadd.f32 %v2244_v2, %v2231_v3 }
 0x94a   : > { %v2204_v6 = vpop.f32.mrf.mxu2 }
 0x94b   : > { %v2205_v7 = vadd.f32 %v3237_v37, %v2204_v6  ;;  %v2249_v8 = vadd.f32 %v2245_v4, %v3976_v52  ;;  %v2218_v9 = vpop.f32.mrf.mxu3 }
 0x94d   : > { %v2219_v10 = vadd.f32 %v2218_v9, %v2205_v7  ;;  %2253 = vadd.xlane.f32.xlu1 %v2249_v8 }
 0x94f   : > { %v2233_v11 = vadd.f32 %v2232_v5, %v2219_v10 }
 0x951   : > { %v2247_v13 = vadd.f32 %v2246_v12, %v2233_v11 }
 0x953   : > { %v2250_v14 = vadd.f32 %v2247_v13, %v3978_v53 }
 0x955   : > { %2255 = vadd.xlane.f32.xlu2 %v2250_v14 }
 0x9c0   : > { %v2254_v15 = vpop.xlane.xlu1 %2253 }
 0x9c1   : > { %v2257_v16 = vmul.f32 %v2254_v15, %v3886_v46 }
 0x9c3   : > { %v2259_v17 = vsub.f32 %v2249_v8, %v2257_v16 }
 0x9c5   : > { %v2261_v18 = vmul.f32 %v2259_v17, %v2259_v17 }
 0x9c7   : > { %2263 = vadd.xlane.f32.xlu0 %v2261_v18 }
 0x9c8   : > { %v2256_v19 = vpop.xlane.xlu2 %2255 }
 0x9c9   : > { %v2258_v20 = vmul.f32 %v2256_v19, %v3886_v46 }
 0x9cb   : > { %v2260_v52 = vsub.f32 %v2250_v14, %v2258_v20 }
 0x9cd   : > { %v2262_v21 = vmul.f32 %v2260_v52, %v2260_v52 }
 0x9cf   : > { %2265 = vadd.xlane.f32.xlu1 %v2262_v21 }
 0xa3a   : > { %v2264_v23 = vpop.xlane.xlu0 %2263 }
 0xa3b   : > { %v2267_v24 = vmul.f32 %v2264_v23, %v3886_v46 }
 0xa3d   : > { %v2269_v25 = vadd.f32 1e-12, %v2267_v24 }
 0xa3f   : > { %3294 = vrsqrt.f32 %v2269_v25  ;;  %vm2277_vm4 = vweird.f32 %v2269_v25 }
 0xa42   : > { %v2266_v53 = vpop.xlane.xlu1 %2265 }
 0xa43   : > { %v2268_v28 = vmul.f32 %v2266_v53, %v3886_v46 }
 0xa45   : > { %v3295_v30 = vpop.eup %3294  ;;  %v2270_v31 = vadd.f32 1e-12, %v2268_v28 }
 0xa46   : > { %v2272_v29 = vmul.f32 %v3295_v30, %v2269_v25  ;;  %vm2278_vm3 = vweird.f32 %v3295_v30 }
 0xa47   : > { %3296 = vrsqrt.f32 %v2270_v31  ;;  %vm2279_vm5 = vmor %vm2277_vm4, %vm2278_vm3  ;;  %vm2287_vm7 = vweird.f32 %v2270_v31 }
 0xa48   : > { %v2273_v32 = vmul.f32 %v3295_v30, %v2272_v29 }
 0xa4a   : > { %v2274_v33 = vmul.f32 0.5, %v2273_v32 }
 0xa4c   : > { %v2275_v34 = vsub.f32 1.5, %v2274_v33 }
 0xa4d   : > { %v3297_v35 = vpop.eup %3296 }
 0xa4e   : > { %v2276_v36 = vmul.f32 %v3295_v30, %v2275_v34  ;;  %v2282_v39 = vmul.f32 %v3297_v35, %v2270_v31  ;;  %vm2288_vm6 = vweird.f32 %v3297_v35 }
 0xa4f   : > { %vm2289_vm8 = vmor %vm2287_vm7, %vm2288_vm6 }
 0xa50   : > { %v2280_v46 = vsel %vm2279_vm5, %v3295_v30, %v2276_v36  ;;  %v2283_v41 = vmul.f32 %v3297_v35, %v2282_v39 }
 0xa51   : > { %v2291_v44 = vmul.f32 %v2280_v46, %v2259_v17 }
 0xa52   : > { %v2284_v42 = vmul.f32 0.5, %v2283_v41 }
 0xa53   : > { %v2296_v45 = vmul.f32 %v3238_v40, %v2291_v44 }
 0xa54   : > { %v2285_v47 = vsub.f32 1.5, %v2284_v42 }
 0xa55   : > { %v2301_v50 = vadd.f32 %v3239_v43, %v2296_v45 }
 0xa56   : > { %v2286_v54 = vmul.f32 %v3297_v35, %v2285_v47 }
 0xa57   : > { %2303 = vst [vmem:[#allocation2] sm:$0xff] %v2301_v50 }
 0xa58   : > { %v2290_v51 = vsel %vm2289_vm8, %v3297_v35, %v2286_v54 }
 0xa59   : > { %v2292_v55 = vmul.f32 %v2290_v51, %v2260_v52 }
 0xa5b   : > { %v2297_v26 = vmul.f32 %v3238_v40, %v2292_v55  ;;  %2308 = sbr.rel (%p3018_p5) target bundleno = 2952 (0xb88), region = 120 }
 0xa5d   : > { %v2302_v48 = vadd.f32 %v3239_v43, %v2297_v26 }
 0xa5f   : > { %2304 = vst [vmem:[#allocation2 + $0x8] sm:$0xff] %v2302_v48 }
 0xa60   : > { %v3159_v27 = vld [vmem:[%s4225_s30 + $0x38] sm:$0xff]  ;;  %v3158_v49 = vld [vmem:[%s4225_s30 + $0x30] sm:$0xff]  ;;  %v2405_v58 = vld [vmem:[%s4227_s16 + $0x68] sm:$0xff]  ;;  %v2309_v7 = vpack.c.bf16 %v2301_v50, %v2301_v50  ;;  %vm2432_vm9 = vcmask 1024  }
 0xa61   : > { %2378 = vmatpush.bf16.msra.mxu0 %v3159_v27  ;;  %v2407_v56 = vld [vmem:[%s4226_s25 + $0x78] sm:$0xff]  ;;  %v2406_v57 = vld [vmem:[%s4227_s16 + $0x70] sm:$0xff]  ;;  %v3157_v59 = vld [vmem:[%s4225_s30 + $0x28] sm:$0xff] }
 0xa62   : > { %2412 = vmatpush.msra.mxu1 %v2407_v56  ;;  %v2404_v22 = vld [vmem:[%s4227_s16 + $0x60] sm:$0xff]  ;;  %v2403_v60 = vld [vmem:[%s4227_s16 + $0x58] sm:$0xff]  ;;  %v2402_v37 = vld [vmem:[%s4227_s16 + $0x50] sm:$0xff] }
 0xa63   : > { %v3156_v61 = vld [vmem:[%s4225_s30 + $0x20] sm:$0xff]  ;;  %v2401_v62 = vld [vmem:[%s4227_s16 + $0x48] sm:$0xff]  ;;  %v3155_v63 = vld [vmem:[%s4225_s30 + $0x18] sm:$0xff] }
 0xa64   : > { %2413 = vmatpush.msra.mxu1 %v2406_v57  ;;  %v2400_v0 = vld [vmem:[%s4227_s16 + $0x40] sm:$0xff]  ;;  %v2399_v38 = vld [vmem:[%s4227_s16 + $0x38] sm:$0xff]  ;;  %v3154_v1 = vld [vmem:[%s4225_s30 + $0x10] sm:$0xff] }
 0xa65   : > { %2379 = vmatpush.bf16.msra.mxu0 %v3158_v49  ;;  %v2398_v2 = vld [vmem:[%s4227_s16 + $0x30] sm:$0xff]  ;;  %v2397_v3 = vld [vmem:[%s4227_s16 + $0x28] sm:$0xff]  ;;  %v3152_v6 = vld [vmem:[%s4225_s30] sm:$0xff] }
 0xa66   : > { %2414 = vmatpush.msra.mxu1 %v2405_v58  ;;  %v3153_v4 = vld [vmem:[%s4225_s30 + $0x8] sm:$0xff]  ;;  %v2396_v8 = vld [vmem:[%s4227_s16 + $0x20] sm:$0xff]  ;;  %v2395_v9 = vld [vmem:[%s4227_s16 + $0x18] sm:$0xff] }
 0xa67   : > { %v2394_v10 = vld [vmem:[%s4227_s16 + $0x10] sm:$0xff]  ;;  %v2393_v5 = vld [vmem:[%s4227_s16 + $0x8] sm:$0xff]  ;;  %v2392_v11 = vld [vmem:[%s4227_s16] sm:$0xff] }
 0xa68   : > { %2415 = vmatpush.msra.mxu1 %v2404_v22  ;;  %v3298_v12 = vld [vmem:[#allocation9] ss:$0 sm:$0xff]  ;;  %v3299_v17 = vld [vmem:[#allocation4] ss:$0 sm:$0xff] }
 0xa69   : > { %2380 = vmatpush.bf16.msra.mxu0 %v3157_v59 }
 0xa6a   : > { %2416 = vmatpush.msra.mxu1 %v2403_v60 }
 0xa6c   : > { %2417 = vmatpush.msra.mxu1 %v2402_v37 }
 0xa6d   : > { %2381 = vmatpush.bf16.msra.mxu0 %v3156_v61 }
 0xa6e   : > { %2418 = vmatpush.msra.mxu1 %v2401_v62 }
 0xa70   : > { %2419 = vmatpush.msra.mxu1 %v2400_v0 }
 0xa71   : > { %2382 = vmatpush.bf16.msra.mxu0 %v3155_v63 }
 0xa72   : > { %2420 = vmatpush.msra.mxu1 %v2399_v38 }
 0xa74   : > { %2421 = vmatpush.msra.mxu1 %v2398_v2 }
 0xa75   : > { %2383 = vmatpush.bf16.msra.mxu0 %v3154_v1 }
 0xa76   : > { %2422 = vmatpush.msra.mxu1 %v2397_v3 }
 0xa78   : > { %2423 = vmatpush.msra.mxu1 %v2396_v8 }
 0xa79   : > { %2384 = vmatpush.bf16.msra.mxu0 %v3153_v4 }
 0xa7a   : > { %2424 = vmatpush.msra.mxu1 %v2395_v9 }
 0xa7c   : > { %2425 = vmatpush.msra.mxu1 %v2394_v10 }
 0xa7d   : > { %2385 = vmatpush.bf16.msra.mxu0 %v3152_v6 }
 0xa7e   : > { %2426 = vmatpush.msra.mxu1 %v2393_v5 }
 0xa80   : > { %2386 = vmatmul.bf16.vlgmr.msra.gmra.mxu0 %v2309_v7  ;;  %2427 = vmatpush.msra.mxu1 %v2392_v11 }
 0xafd   : > { %v2387_v13 = vpop.f32.mrf.mxu0 }
 0xafe   : > { %v2388_v14 = vadd.f32 %v3298_v12, %v2387_v13 }
 0xb00   : > { %3300 = vtanh.f32 %v2388_v14 }
 0xb05   : > { %v2389_v15 = vpop.f32.mrf.mxu0 }
 0xb06   : > { %v3301_v16 = vpop.eup %3300 }
 0xb07   : > { %2428 = vmatmul.f32.vlgmr.msra.gmra.mxu1 %v3301_v16 }
 0xb84   : > { %v2429_v18 = vpop.f32.mrf.mxu1 }
 0xb85   : > { %v2430_v19 = vadd.f32 %v3299_v17, %v2429_v18 }
 0xb87   : > { %2433 = vst.msk [vmem:[%s4228_s19] sm:$0x3] %vm2432_vm9, %v2430_v19 }
 0xb88 PF: > { %s4229_s25 = sld [smem:[#allocation14_spill]]  ;;  %s4232_s23 = smov %s3426_s24 }
 0xb89   : > { %s4230_s14 = sld [smem:[#allocation13_spill]] }
 0xb8a   : > { %s4231_s2 = sld [smem:[#allocation15_spill]] }
 0xb8e   : > { %p35_p8 = scmp.ge.s32.totalorder %s4229_s25, 4  }
 0xb8f   : > { %s4233_s24 = smov %s4230_s14 }
 0xb90   :  { %37 = sbr.rel (!%p35_p8) target bundleno = 21 (0x15), region = 191 }
 0xb95   :  { %2445 = vsyncpa [#allocation6], 1 }
 0xb96   :  { %2447 = vsyncpa [#allocation6 + $0x1], 1 }
 0xb97   :  { %2448 = vsyncpa [#allocation8], 1 }
 0xb98   :  { %2450 = vsyncpa [#allocation8 + $0x1], 1 }

</bundles_post_ra>
